<compile_context>
chip_gen: v7x
topology: tpu7x:2x2x1
jax: 0.10.0
libtpu: 0.0.40
codegen_flags: <defaults>
</compile_context>

<pallas_src>
import jax
import jax.numpy as jnp
from jax.experimental import pallas as pl
from jax.experimental.pallas import tpu as pltpu

# ----------------------------- model sizes -----------------------------
H = 128           # hidden_size (== img_feat_size)
D = 128           # text_feat_size
L = 8             # max_sent_length
B, CN, N = 2, 2, 1
LN_EPS = 1e-5
OUT_PAD = 128     # lane-dense padding for the 2-wide out_trans logits


# ----------------------------- fused Pallas kernel -----------------------------
def _make_fused_forward(bc, seq_len, hidden, dtext):
    """Single fused pallas_call for the (text side of the) forward."""
    rows_txt = bc * seq_len

    def kernel(bf0_ref, bf1_ref, bm_ref, pm_ref, nm_ref,
               tw_ref, tb_ref, tg_ref, tbe_ref,
               owa_ref, owb_ref, ob_ref,
               pos_score_ref, neg_score_ref, pos_feats_ref, neg_feats_ref):

        tw = tw_ref[...]
        tb = tb_ref[...]
        tg = tg_ref[...]
        tbe = tbe_ref[...]

        def text_trans(x):
            # Linear + ReLU + LayerNorm (Dropout == identity in eval mode).
            y = jnp.dot(x, tw, preferred_element_type=jnp.float32) + tb
            y = jnp.maximum(y, 0.0)
            mu = jnp.mean(y, axis=-1, keepdims=True)
            var = jnp.mean(jnp.square(y - mu), axis=-1, keepdims=True)
            return (y - mu) * jax.lax.rsqrt(var + LN_EPS) * tg + tbe

        # ---- text_trans on bert_feat0 / bert_feat1 (shared weights) ----
        pos_seq = text_trans(bf0_ref[...]).reshape(bc, seq_len, hidden)
        neg_seq = text_trans(bf1_ref[...]).reshape(bc, seq_len, hidden)

        # ---- mask math in-kernel from raw int32 masks (cheap VPU work) ----
        bm_i = bm_ref[...]                                    # (bc, L) int32
        bert_m = bm_i.astype(jnp.float32)
        pos_m = (pm_ref[...] != bm_i).astype(jnp.float32)
        neg_m = (nm_ref[...] != bm_i).astype(jnp.float32)

        def masked_mean(seq, m2d):
            s = jnp.sum(seq * m2d[:, :, None], axis=1)        # (bc, H)
            # guard: reference would produce NaN for all-zero mask rows
            cnt = jnp.maximum(jnp.sum(m2d, axis=1, keepdims=True), 1.0)
            return s / cnt                                    # exact divide

        # mention() stand-in: pool with bert_mask
        pos_fusion = masked_mean(pos_seq, bert_m)
        neg_fusion = masked_mean(neg_seq, bert_m)
        # entity() stand-in: pool with entity masks
        pos_feats = masked_mean(pos_seq, pos_m)
        neg_feats = masked_mean(neg_seq, neg_m)

        pos_feats_ref[...] = pos_feats
        neg_feats_ref[...] = neg_feats

        # ---- out_trans with split weight halves: no lane-axis concat ----
        owa = owa_ref[...]
        owb = owb_ref[...]
        ob = ob_ref[...]
        pos_score_ref[...] = (
            jnp.dot(pos_fusion, owa, preferred_element_type=jnp.float32)
            + jnp.dot(pos_feats, owb, preferred_element_type=jnp.float32) + ob)
        neg_score_ref[...] = (
            jnp.dot(neg_fusion, owa, preferred_element_type=jnp.float32)
            + jnp.dot(neg_feats, owb, preferred_element_type=jnp.float32) + ob)

    def full(shape):
        return pl.BlockSpec(shape, lambda i: (0,) * len(shape))

    flops = int(2 * 2 * rows_txt * dtext * hidden            # text_trans matmuls
                + 4 * 2 * bc * hidden * OUT_PAD               # out_trans dots
                + 16 * rows_txt * hidden)                     # LN / pooling elementwise
    bytes_accessed = int(4 * (2 * rows_txt * dtext            # bert features
                              + 3 * bc * seq_len              # int masks
                              + dtext * hidden + 3 * hidden   # text_trans params
                              + 2 * hidden * OUT_PAD + OUT_PAD  # out_trans params
                              + 2 * bc * OUT_PAD + 2 * bc * hidden))  # outputs

    return pl.pallas_call(
        kernel,
        grid=(1,),
        in_specs=[
            full((rows_txt, dtext)),       # bert_feat0 (BC*L, D)
            full((rows_txt, dtext)),       # bert_feat1 (BC*L, D)
            full((bc, seq_len)),           # bert_mask          (int32)
            full((bc, seq_len)),           # all_pos_input_mask (int32)
            full((bc, seq_len)),           # all_neg_input_mask (int32)
            full((dtext, hidden)),         # text_w
            full((1, hidden)),             # text_b
            full((1, hidden)),             # text_gamma
            full((1, hidden)),             # text_beta
            full((hidden, OUT_PAD)),       # out_w fusion-half (zero-padded)
            full((hidden, OUT_PAD)),       # out_w feats-half  (zero-padded)
            full((1, OUT_PAD)),            # out_b (zero-padded)
        ],
        out_specs=[
            full((bc, OUT_PAD)),           # pos_score (lane-padded)
            full((bc, OUT_PAD)),           # neg_score (lane-padded)
            full((bc, hidden)),            # pos_feats_trans
            full((bc, hidden)),            # neg_feats_trans
        ],
        out_shape=[
            jax.ShapeDtypeStruct((bc, OUT_PAD), jnp.float32),
            jax.ShapeDtypeStruct((bc, OUT_PAD), jnp.float32),
            jax.ShapeDtypeStruct((bc, hidden), jnp.float32),
            jax.ShapeDtypeStruct((bc, hidden), jnp.float32),
        ],
        compiler_params=pltpu.CompilerParams(
            dimension_semantics=("arbitrary",)),
        cost_estimate=pl.CostEstimate(
            flops=flops, transcendentals=2 * rows_txt,
            bytes_accessed=bytes_accessed),
    )


# ----------------------------- parameters -----------------------------
def init_params(key):
    k1, k2 = jax.random.split(key, 2)
    # text_trans: Linear(D, H) + ReLU + LayerNorm(H)
    # out_trans : Dropout + Linear(2H, 2); its weight is split into the two
    # (H, 2) halves and zero-padded to 128 lanes ONCE here (per-step constant),
    # so no per-call zero+scatter HBM traffic.
    out_w = 0.02 * jax.random.normal(k2, (2 * H, 2), jnp.float32)
    out_b = jnp.zeros((2,), jnp.float32)
    return {
        "text_w": 0.02 * jax.random.normal(k1, (D, H), jnp.float32),
        "text_b": jnp.zeros((1, H), jnp.float32),
        "text_g": jnp.ones((1, H), jnp.float32),
        "text_be": jnp.zeros((1, H), jnp.float32),
        "out_w_a": jnp.zeros((H, OUT_PAD), jnp.float32).at[:, :2].set(out_w[:H]),
        "out_w_b": jnp.zeros((H, OUT_PAD), jnp.float32).at[:, :2].set(out_w[H:]),
        "out_b": jnp.zeros((1, OUT_PAD), jnp.float32).at[:, :2].set(out_b),
    }


def _cross_entropy(logits, labels):
    logp = jax.nn.log_softmax(logits, axis=-1)
    return -jnp.mean(jnp.take_along_axis(logp, labels[:, None], axis=1))


# ----------------------------- forward -----------------------------
@jax.jit
def nel_forward(params, bert_feat0, bert_feat1, img, bert_mask, batch):
    # 4-D branch of forward(): bert_feat[1] has shape (B, CN, L, D), N == 1.
    Bx, CNx, Lx, Dx = bert_feat1.shape
    BCx = Bx * CNx

    # TODO(synk): img / ent_img_feat / neg_ent_img_feat feed img_trans ->
    # ImgLevel -> Word/Phrase/SentLevel -> GatedFusion, whose sources are not
    # provided; with the masked-mean fusion stand-in that whole path is dead,
    # so it is not computed (it was the largest DMA + matmul previously).
    del img

    fused_call = _make_fused_forward(BCx, Lx, H, Dx)
    pos_score_pad, neg_score_pad, pos_feats_trans, neg_feats_trans = fused_call(
        bert_feat0.reshape(BCx * Lx, Dx),
        bert_feat1.reshape(BCx * Lx, Dx),
        bert_mask.reshape(BCx, Lx).astype(jnp.int32),
        batch["all_pos_input_mask"].reshape(BCx, Lx).astype(jnp.int32),
        batch["all_neg_input_mask"].reshape(BCx, Lx).astype(jnp.int32),
        params["text_w"], params["text_b"], params["text_g"], params["text_be"],
        params["out_w_a"], params["out_w_b"], params["out_b"])

    pos_score = pos_score_pad[:, :2]
    neg_score = neg_score_pad[:, :2]

    # ---- CrossEntropy branch (mode='train', multi=False) ----
    pos_label = jnp.ones((BCx,), jnp.int32)
    neg_label = jnp.zeros((BCx * N,), jnp.int32)
    loss = (_cross_entropy(pos_score, pos_label)
            + _cross_entropy(neg_score.reshape(BCx * N, -1), neg_label))
    triplet_loss = jnp.float32(0.0)

    pos_feats = pos_feats_trans.reshape(Bx, CNx, -1)
    neg_feats = neg_feats_trans.reshape(Bx, CNx, N, -1)
    return (loss, triplet_loss), (pos_score, neg_score), (pos_feats, neg_feats)


# ----------------------------- demo -----------------------------
if __name__ == "__main__":
    key = jax.random.PRNGKey(0)
    ks = jax.random.split(key, 8)
    params = init_params(ks[0])

    bert_feat0 = jax.random.normal(ks[1], (B, CN, L, D), jnp.float32)
    bert_feat1 = jax.random.normal(ks[2], (B, CN, L, D), jnp.float32)
    img = jax.random.normal(ks[3], (B, CN, H), jnp.float32)
    bert_mask = jnp.ones((B, CN, L), jnp.int32)          # satisfies the train-mode assert

    all_pos_input_mask = jax.random.bernoulli(ks[4], 0.5, (B, CN, L)).astype(jnp.int32)
    all_neg_input_mask = jax.random.bernoulli(ks[5], 0.5, (B, CN, L)).astype(jnp.int32)
    # guarantee at least one mismatching position per row (same assumption the
    # PyTorch code makes about its data; the kernel also has a max(count,1) guard)
    all_pos_input_mask = all_pos_input_mask.at[..., 0].set(0)
    all_neg_input_mask = all_neg_input_mask.at[..., 0].set(0)

    batch = {
        # ent_img_feat / neg_ent_img_feat are kept for interface fidelity but
        # are unused while the fusion submodules are unavailable (see TODO).
        "ent_img_feat": jax.random.normal(ks[6], (B, CN, H), jnp.float32),
        "neg_ent_img_feat": jax.random.normal(ks[7], (B, CN, H), jnp.float32),
        "all_pos_input_mask": all_pos_input_mask,
        "all_neg_input_mask": all_neg_input_mask,
    }

    out = nel_forward(params, bert_feat0, bert_feat1, img, bert_mask, batch)
    jax.block_until_ready(out)
    print("KERNEL_OK")
</pallas_src>

<mosaic_0001>
module attributes {stable_mosaic.version = 11 : i64} {
  func.func @kernel(%arg0: i32, %arg1: memref<32x128xf32, #tpu.memory_space<vmem>>, %arg2: memref<32x128xf32, #tpu.memory_space<vmem>>, %arg3: memref<4x8xi32, #tpu.memory_space<vmem>>, %arg4: memref<4x8xi32, #tpu.memory_space<vmem>>, %arg5: memref<4x8xi32, #tpu.memory_space<vmem>>, %arg6: memref<128x128xf32, #tpu.memory_space<vmem>>, %arg7: memref<1x128xf32, #tpu.memory_space<vmem>>, %arg8: memref<1x128xf32, #tpu.memory_space<vmem>>, %arg9: memref<1x128xf32, #tpu.memory_space<vmem>>, %arg10: memref<128x128xf32, #tpu.memory_space<vmem>>, %arg11: memref<128x128xf32, #tpu.memory_space<vmem>>, %arg12: memref<1x128xf32, #tpu.memory_space<vmem>>, %arg13: memref<4x128xf32, #tpu.memory_space<vmem>>, %arg14: memref<4x128xf32, #tpu.memory_space<vmem>>, %arg15: memref<4x128xf32, #tpu.memory_space<vmem>>, %arg16: memref<4x128xf32, #tpu.memory_space<vmem>>) attributes {dimension_semantics = [#tpu.dimension_semantics<arbitrary>], iteration_bounds = array<i64: 1>, scalar_prefetch = 0 : i64, scratch_operands = 0 : i64, tpu.core_type = #tpu.core_type<tc>, window_params = [{pipeline_mode = #tpu.pipeline_mode<synchronous>, transform_indices = @transform_0, window_bounds = array<i64: 32, 128>}, {pipeline_mode = #tpu.pipeline_mode<synchronous>, transform_indices = @transform_1, window_bounds = array<i64: 32, 128>}, {pipeline_mode = #tpu.pipeline_mode<synchronous>, transform_indices = @transform_2, window_bounds = array<i64: 4, 8>}, {pipeline_mode = #tpu.pipeline_mode<synchronous>, transform_indices = @transform_3, window_bounds = array<i64: 4, 8>}, {pipeline_mode = #tpu.pipeline_mode<synchronous>, transform_indices = @transform_4, window_bounds = array<i64: 4, 8>}, {pipeline_mode = #tpu.pipeline_mode<synchronous>, transform_indices = @transform_5, window_bounds = array<i64: 128, 128>}, {pipeline_mode = #tpu.pipeline_mode<synchronous>, transform_indices = @transform_6, window_bounds = array<i64: 1, 128>}, {pipeline_mode = #tpu.pipeline_mode<synchronous>, transform_indices = @transform_7, window_bounds = array<i64: 1, 128>}, {pipeline_mode = #tpu.pipeline_mode<synchronous>, transform_indices = @transform_8, window_bounds = array<i64: 1, 128>}, {pipeline_mode = #tpu.pipeline_mode<synchronous>, transform_indices = @transform_9, window_bounds = array<i64: 128, 128>}, {pipeline_mode = #tpu.pipeline_mode<synchronous>, transform_indices = @transform_10, window_bounds = array<i64: 128, 128>}, {pipeline_mode = #tpu.pipeline_mode<synchronous>, transform_indices = @transform_11, window_bounds = array<i64: 1, 128>}, {pipeline_mode = #tpu.pipeline_mode<synchronous>, transform_indices = @transform_12, window_bounds = array<i64: 4, 128>}, {pipeline_mode = #tpu.pipeline_mode<synchronous>, transform_indices = @transform_13, window_bounds = array<i64: 4, 128>}, {pipeline_mode = #tpu.pipeline_mode<synchronous>, transform_indices = @transform_14, window_bounds = array<i64: 4, 128>}, {pipeline_mode = #tpu.pipeline_mode<synchronous>, transform_indices = @transform_15, window_bounds = array<i64: 4, 128>}]} {
    %c0 = arith.constant 0 : index
    %c0_0 = arith.constant 0 : index
    %0 = vector.load %arg6[%c0, %c0_0] : memref<128x128xf32, #tpu.memory_space<vmem>>, vector<128x128xf32>
    %c0_1 = arith.constant 0 : index
    %c0_2 = arith.constant 0 : index
    %1 = vector.load %arg7[%c0_1, %c0_2] : memref<1x128xf32, #tpu.memory_space<vmem>>, vector<1x128xf32>
    %c0_3 = arith.constant 0 : index
    %c0_4 = arith.constant 0 : index
    %2 = vector.load %arg8[%c0_3, %c0_4] : memref<1x128xf32, #tpu.memory_space<vmem>>, vector<1x128xf32>
    %c0_5 = arith.constant 0 : index
    %c0_6 = arith.constant 0 : index
    %3 = vector.load %arg9[%c0_5, %c0_6] : memref<1x128xf32, #tpu.memory_space<vmem>>, vector<1x128xf32>
    %c0_7 = arith.constant 0 : index
    %c0_8 = arith.constant 0 : index
    %4 = vector.load %arg1[%c0_7, %c0_8] : memref<32x128xf32, #tpu.memory_space<vmem>>, vector<32x128xf32>
    %cst = arith.constant dense<0.000000e+00> : vector<32x128xf32>
    %5 = tpu.matmul %4, %0, %cst {dimension_numbers = #tpu.dot_dimension_numbers<[1], [0], [0], [1], [0, 0, 1, 1], [], []>} : vector<32x128xf32>, vector<128x128xf32>, vector<32x128xf32> -> vector<32x128xf32>
    %6 = vector.broadcast %1 : vector<1x128xf32> to vector<32x128xf32>
    %7 = arith.addf %5, %6 : vector<32x128xf32>
    %cst_9 = arith.constant 0.000000e+00 : f32
    %8 = vector.broadcast %cst_9 : f32 to vector<32x128xf32>
    %9 = arith.maximumf %7, %8 : vector<32x128xf32>
    %cst_10 = arith.constant dense<0.000000e+00> : vector<32xf32>
    %10 = vector.multi_reduction <add>, %9, %cst_10 [1] : vector<32x128xf32> to vector<32xf32>
    %11 = vector.shape_cast %10 : vector<32xf32> to vector<32x1xf32>
    %cst_11 = arith.constant 1.280000e+02 : f32
    %12 = vector.broadcast %cst_11 : f32 to vector<32x1xf32>
    %13 = arith.divf %11, %12 : vector<32x1xf32>
    %14 = vector.broadcast %13 : vector<32x1xf32> to vector<32x128xf32>
    %15 = arith.subf %9, %14 : vector<32x128xf32>
    %16 = arith.mulf %15, %15 : vector<32x128xf32>
    %cst_12 = arith.constant dense<0.000000e+00> : vector<32xf32>
    %17 = vector.multi_reduction <add>, %16, %cst_12 [1] : vector<32x128xf32> to vector<32xf32>
    %18 = vector.shape_cast %17 : vector<32xf32> to vector<32x1xf32>
    %cst_13 = arith.constant 1.280000e+02 : f32
    %19 = vector.broadcast %cst_13 : f32 to vector<32x1xf32>
    %20 = arith.divf %18, %19 : vector<32x1xf32>
    %21 = vector.broadcast %13 : vector<32x1xf32> to vector<32x128xf32>
    %22 = arith.subf %9, %21 : vector<32x128xf32>
    %cst_14 = arith.constant 9.99999974E-6 : f32
    %23 = vector.broadcast %cst_14 : f32 to vector<32x1xf32>
    %24 = arith.addf %20, %23 : vector<32x1xf32>
    %25 = math.rsqrt %24 : vector<32x1xf32>
    %26 = vector.broadcast %25 : vector<32x1xf32> to vector<32x128xf32>
    %27 = arith.mulf %22, %26 : vector<32x128xf32>
    %28 = vector.broadcast %2 : vector<1x128xf32> to vector<32x128xf32>
    %29 = arith.mulf %27, %28 : vector<32x128xf32>
    %30 = vector.broadcast %3 : vector<1x128xf32> to vector<32x128xf32>
    %31 = arith.addf %29, %30 : vector<32x128xf32>
    %32 = vector.shape_cast %31 : vector<32x128xf32> to vector<4x8x128xf32>
    %c0_15 = arith.constant 0 : index
    %c0_16 = arith.constant 0 : index
    %33 = vector.load %arg2[%c0_15, %c0_16] : memref<32x128xf32, #tpu.memory_space<vmem>>, vector<32x128xf32>
    %cst_17 = arith.constant dense<0.000000e+00> : vector<32x128xf32>
    %34 = tpu.matmul %33, %0, %cst_17 {dimension_numbers = #tpu.dot_dimension_numbers<[1], [0], [0], [1], [0, 0, 1, 1], [], []>} : vector<32x128xf32>, vector<128x128xf32>, vector<32x128xf32> -> vector<32x128xf32>
    %35 = vector.broadcast %1 : vector<1x128xf32> to vector<32x128xf32>
    %36 = arith.addf %34, %35 : vector<32x128xf32>
    %cst_18 = arith.constant 0.000000e+00 : f32
    %37 = vector.broadcast %cst_18 : f32 to vector<32x128xf32>
    %38 = arith.maximumf %36, %37 : vector<32x128xf32>
    %cst_19 = arith.constant dense<0.000000e+00> : vector<32xf32>
    %39 = vector.multi_reduction <add>, %38, %cst_19 [1] : vector<32x128xf32> to vector<32xf32>
    %40 = vector.shape_cast %39 : vector<32xf32> to vector<32x1xf32>
    %cst_20 = arith.constant 1.280000e+02 : f32
    %41 = vector.broadcast %cst_20 : f32 to vector<32x1xf32>
    %42 = arith.divf %40, %41 : vector<32x1xf32>
    %43 = vector.broadcast %42 : vector<32x1xf32> to vector<32x128xf32>
    %44 = arith.subf %38, %43 : vector<32x128xf32>
    %45 = arith.mulf %44, %44 : vector<32x128xf32>
    %cst_21 = arith.constant dense<0.000000e+00> : vector<32xf32>
    %46 = vector.multi_reduction <add>, %45, %cst_21 [1] : vector<32x128xf32> to vector<32xf32>
    %47 = vector.shape_cast %46 : vector<32xf32> to vector<32x1xf32>
    %cst_22 = arith.constant 1.280000e+02 : f32
    %48 = vector.broadcast %cst_22 : f32 to vector<32x1xf32>
    %49 = arith.divf %47, %48 : vector<32x1xf32>
    %50 = vector.broadcast %42 : vector<32x1xf32> to vector<32x128xf32>
    %51 = arith.subf %38, %50 : vector<32x128xf32>
    %cst_23 = arith.constant 9.99999974E-6 : f32
    %52 = vector.broadcast %cst_23 : f32 to vector<32x1xf32>
    %53 = arith.addf %49, %52 : vector<32x1xf32>
    %54 = math.rsqrt %53 : vector<32x1xf32>
    %55 = vector.broadcast %54 : vector<32x1xf32> to vector<32x128xf32>
    %56 = arith.mulf %51, %55 : vector<32x128xf32>
    %57 = vector.broadcast %2 : vector<1x128xf32> to vector<32x128xf32>
    %58 = arith.mulf %56, %57 : vector<32x128xf32>
    %59 = vector.broadcast %3 : vector<1x128xf32> to vector<32x128xf32>
    %60 = arith.addf %58, %59 : vector<32x128xf32>
    %61 = vector.shape_cast %60 : vector<32x128xf32> to vector<4x8x128xf32>
    %c0_24 = arith.constant 0 : index
    %c0_25 = arith.constant 0 : index
    %62 = vector.load %arg3[%c0_24, %c0_25] : memref<4x8xi32, #tpu.memory_space<vmem>>, vector<4x8xi32>
    %63 = arith.sitofp %62 : vector<4x8xi32> to vector<4x8xf32>
    %c0_26 = arith.constant 0 : index
    %c0_27 = arith.constant 0 : index
    %64 = vector.load %arg4[%c0_26, %c0_27] : memref<4x8xi32, #tpu.memory_space<vmem>>, vector<4x8xi32>
    %65 = arith.cmpi ne, %64, %62 : vector<4x8xi32>
    %66 = arith.extui %65 : vector<4x8xi1> to vector<4x8xi32>
    %67 = arith.sitofp %66 : vector<4x8xi32> to vector<4x8xf32>
    %c0_28 = arith.constant 0 : index
    %c0_29 = arith.constant 0 : index
    %68 = vector.load %arg5[%c0_28, %c0_29] : memref<4x8xi32, #tpu.memory_space<vmem>>, vector<4x8xi32>
    %69 = arith.cmpi ne, %68, %62 : vector<4x8xi32>
    %70 = arith.extui %69 : vector<4x8xi1> to vector<4x8xi32>
    %71 = arith.sitofp %70 : vector<4x8xi32> to vector<4x8xf32>
    %72 = vector.shape_cast %63 : vector<4x8xf32> to vector<4x8x1xf32>
    %73 = vector.broadcast %72 : vector<4x8x1xf32> to vector<4x8x128xf32>
    %74 = arith.mulf %32, %73 : vector<4x8x128xf32>
    %cst_30 = arith.constant dense<0.000000e+00> : vector<4x128xf32>
    %75 = vector.multi_reduction <add>, %74, %cst_30 [1] : vector<4x8x128xf32> to vector<4x128xf32>
    %cst_31 = arith.constant dense<0.000000e+00> : vector<4xf32>
    %76 = vector.multi_reduction <add>, %63, %cst_31 [1] : vector<4x8xf32> to vector<4xf32>
    %77 = vector.shape_cast %76 : vector<4xf32> to vector<4x1xf32>
    %cst_32 = arith.constant 1.000000e+00 : f32
    %78 = vector.broadcast %cst_32 : f32 to vector<4x1xf32>
    %79 = arith.maximumf %77, %78 : vector<4x1xf32>
    %80 = vector.broadcast %79 : vector<4x1xf32> to vector<4x128xf32>
    %81 = arith.divf %75, %80 : vector<4x128xf32>
    %82 = vector.shape_cast %63 : vector<4x8xf32> to vector<4x8x1xf32>
    %83 = vector.broadcast %82 : vector<4x8x1xf32> to vector<4x8x128xf32>
    %84 = arith.mulf %61, %83 : vector<4x8x128xf32>
    %cst_33 = arith.constant dense<0.000000e+00> : vector<4x128xf32>
    %85 = vector.multi_reduction <add>, %84, %cst_33 [1] : vector<4x8x128xf32> to vector<4x128xf32>
    %cst_34 = arith.constant dense<0.000000e+00> : vector<4xf32>
    %86 = vector.multi_reduction <add>, %63, %cst_34 [1] : vector<4x8xf32> to vector<4xf32>
    %87 = vector.shape_cast %86 : vector<4xf32> to vector<4x1xf32>
    %cst_35 = arith.constant 1.000000e+00 : f32
    %88 = vector.broadcast %cst_35 : f32 to vector<4x1xf32>
    %89 = arith.maximumf %87, %88 : vector<4x1xf32>
    %90 = vector.broadcast %89 : vector<4x1xf32> to vector<4x128xf32>
    %91 = arith.divf %85, %90 : vector<4x128xf32>
    %92 = vector.shape_cast %67 : vector<4x8xf32> to vector<4x8x1xf32>
    %93 = vector.broadcast %92 : vector<4x8x1xf32> to vector<4x8x128xf32>
    %94 = arith.mulf %32, %93 : vector<4x8x128xf32>
    %cst_36 = arith.constant dense<0.000000e+00> : vector<4x128xf32>
    %95 = vector.multi_reduction <add>, %94, %cst_36 [1] : vector<4x8x128xf32> to vector<4x128xf32>
    %cst_37 = arith.constant dense<0.000000e+00> : vector<4xf32>
    %96 = vector.multi_reduction <add>, %67, %cst_37 [1] : vector<4x8xf32> to vector<4xf32>
    %97 = vector.shape_cast %96 : vector<4xf32> to vector<4x1xf32>
    %cst_38 = arith.constant 1.000000e+00 : f32
    %98 = vector.broadcast %cst_38 : f32 to vector<4x1xf32>
    %99 = arith.maximumf %97, %98 : vector<4x1xf32>
    %100 = vector.broadcast %99 : vector<4x1xf32> to vector<4x128xf32>
    %101 = arith.divf %95, %100 : vector<4x128xf32>
    %102 = vector.shape_cast %71 : vector<4x8xf32> to vector<4x8x1xf32>
    %103 = vector.broadcast %102 : vector<4x8x1xf32> to vector<4x8x128xf32>
    %104 = arith.mulf %61, %103 : vector<4x8x128xf32>
    %cst_39 = arith.constant dense<0.000000e+00> : vector<4x128xf32>
    %105 = vector.multi_reduction <add>, %104, %cst_39 [1] : vector<4x8x128xf32> to vector<4x128xf32>
    %cst_40 = arith.constant dense<0.000000e+00> : vector<4xf32>
    %106 = vector.multi_reduction <add>, %71, %cst_40 [1] : vector<4x8xf32> to vector<4xf32>
    %107 = vector.shape_cast %106 : vector<4xf32> to vector<4x1xf32>
    %cst_41 = arith.constant 1.000000e+00 : f32
    %108 = vector.broadcast %cst_41 : f32 to vector<4x1xf32>
    %109 = arith.maximumf %107, %108 : vector<4x1xf32>
    %110 = vector.broadcast %109 : vector<4x1xf32> to vector<4x128xf32>
    %111 = arith.divf %105, %110 : vector<4x128xf32>
    %c0_42 = arith.constant 0 : index
    %c0_43 = arith.constant 0 : index
    %112 = vector.load %arg15[%c0_42, %c0_43] : memref<4x128xf32, #tpu.memory_space<vmem>>, vector<4x128xf32>
    tpu.vector_store %arg15[%c0_42, %c0_43], %101 {strides = array<i32>} : memref<4x128xf32, #tpu.memory_space<vmem>>, vector<4x128xf32>,
    %c0_44 = arith.constant 0 : index
    %c0_45 = arith.constant 0 : index
    %113 = vector.load %arg16[%c0_44, %c0_45] : memref<4x128xf32, #tpu.memory_space<vmem>>, vector<4x128xf32>
    tpu.vector_store %arg16[%c0_44, %c0_45], %111 {strides = array<i32>} : memref<4x128xf32, #tpu.memory_space<vmem>>, vector<4x128xf32>,
    %c0_46 = arith.constant 0 : index
    %c0_47 = arith.constant 0 : index
    %114 = vector.load %arg10[%c0_46, %c0_47] : memref<128x128xf32, #tpu.memory_space<vmem>>, vector<128x128xf32>
    %c0_48 = arith.constant 0 : index
    %c0_49 = arith.constant 0 : index
    %115 = vector.load %arg11[%c0_48, %c0_49] : memref<128x128xf32, #tpu.memory_space<vmem>>, vector<128x128xf32>
    %c0_50 = arith.constant 0 : index
    %c0_51 = arith.constant 0 : index
    %116 = vector.load %arg12[%c0_50, %c0_51] : memref<1x128xf32, #tpu.memory_space<vmem>>, vector<1x128xf32>
    %cst_52 = arith.constant dense<0.000000e+00> : vector<4x128xf32>
    %117 = tpu.matmul %81, %114, %cst_52 {dimension_numbers = #tpu.dot_dimension_numbers<[1], [0], [0], [1], [0, 0, 1, 1], [], []>} : vector<4x128xf32>, vector<128x128xf32>, vector<4x128xf32> -> vector<4x128xf32>
    %cst_53 = arith.constant dense<0.000000e+00> : vector<4x128xf32>
    %118 = tpu.matmul %101, %115, %cst_53 {dimension_numbers = #tpu.dot_dimension_numbers<[1], [0], [0], [1], [0, 0, 1, 1], [], []>} : vector<4x128xf32>, vector<128x128xf32>, vector<4x128xf32> -> vector<4x128xf32>
    %119 = arith.addf %117, %118 : vector<4x128xf32>
    %120 = vector.broadcast %116 : vector<1x128xf32> to vector<4x128xf32>
    %121 = arith.addf %119, %120 : vector<4x128xf32>
    %c0_54 = arith.constant 0 : index
    %c0_55 = arith.constant 0 : index
    %122 = vector.load %arg13[%c0_54, %c0_55] : memref<4x128xf32, #tpu.memory_space<vmem>>, vector<4x128xf32>
    tpu.vector_store %arg13[%c0_54, %c0_55], %121 {strides = array<i32>} : memref<4x128xf32, #tpu.memory_space<vmem>>, vector<4x128xf32>,
    %cst_56 = arith.constant dense<0.000000e+00> : vector<4x128xf32>
    %123 = tpu.matmul %91, %114, %cst_56 {dimension_numbers = #tpu.dot_dimension_numbers<[1], [0], [0], [1], [0, 0, 1, 1], [], []>} : vector<4x128xf32>, vector<128x128xf32>, vector<4x128xf32> -> vector<4x128xf32>
    %cst_57 = arith.constant dense<0.000000e+00> : vector<4x128xf32>
    %124 = tpu.matmul %111, %115, %cst_57 {dimension_numbers = #tpu.dot_dimension_numbers<[1], [0], [0], [1], [0, 0, 1, 1], [], []>} : vector<4x128xf32>, vector<128x128xf32>, vector<4x128xf32> -> vector<4x128xf32>
    %125 = arith.addf %123, %124 : vector<4x128xf32>
    %126 = vector.broadcast %116 : vector<1x128xf32> to vector<4x128xf32>
    %127 = arith.addf %125, %126 : vector<4x128xf32>
    %c0_58 = arith.constant 0 : index
    %c0_59 = arith.constant 0 : index
    %128 = vector.load %arg14[%c0_58, %c0_59] : memref<4x128xf32, #tpu.memory_space<vmem>>, vector<4x128xf32>
    tpu.vector_store %arg14[%c0_58, %c0_59], %127 {strides = array<i32>} : memref<4x128xf32, #tpu.memory_space<vmem>>, vector<4x128xf32>,
    return
  }
  func.func @transform_0(%arg0: i32) -> (i32, i32) {
    %c0_i32 = arith.constant 0 : i32
    %c0_i32_0 = arith.constant 0 : i32
    %c0_i32_1 = arith.constant 0 : i32
    return %c0_i32, %c0_i32_0 : i32, i32
  }
  func.func @transform_1(%arg0: i32) -> (i32, i32) {
    %c0_i32 = arith.constant 0 : i32
    %c0_i32_0 = arith.constant 0 : i32
    %c0_i32_1 = arith.constant 0 : i32
    return %c0_i32, %c0_i32_0 : i32, i32
  }
  func.func @transform_2(%arg0: i32) -> (i32, i32) {
    %c0_i32 = arith.constant 0 : i32
    %c0_i32_0 = arith.constant 0 : i32
    %c0_i32_1 = arith.constant 0 : i32
    return %c0_i32, %c0_i32_0 : i32, i32
  }
  func.func @transform_3(%arg0: i32) -> (i32, i32) {
    %c0_i32 = arith.constant 0 : i32
    %c0_i32_0 = arith.constant 0 : i32
    %c0_i32_1 = arith.constant 0 : i32
    return %c0_i32, %c0_i32_0 : i32, i32
  }
  func.func @transform_4(%arg0: i32) -> (i32, i32) {
    %c0_i32 = arith.constant 0 : i32
    %c0_i32_0 = arith.constant 0 : i32
    %c0_i32_1 = arith.constant 0 : i32
    return %c0_i32, %c0_i32_0 : i32, i32
  }
  func.func @transform_5(%arg0: i32) -> (i32, i32) {
    %c0_i32 = arith.constant 0 : i32
    %c0_i32_0 = arith.constant 0 : i32
    %c0_i32_1 = arith.constant 0 : i32
    return %c0_i32, %c0_i32_0 : i32, i32
  }
  func.func @transform_6(%arg0: i32) -> (i32, i32) {
    %c0_i32 = arith.constant 0 : i32
    %c0_i32_0 = arith.constant 0 : i32
    %c0_i32_1 = arith.constant 0 : i32
    return %c0_i32, %c0_i32_0 : i32, i32
  }
  func.func @transform_7(%arg0: i32) -> (i32, i32) {
    %c0_i32 = arith.constant 0 : i32
    %c0_i32_0 = arith.constant 0 : i32
    %c0_i32_1 = arith.constant 0 : i32
    return %c0_i32, %c0_i32_0 : i32, i32
  }
  func.func @transform_8(%arg0: i32) -> (i32, i32) {
    %c0_i32 = arith.constant 0 : i32
    %c0_i32_0 = arith.constant 0 : i32
    %c0_i32_1 = arith.constant 0 : i32
    return %c0_i32, %c0_i32_0 : i32, i32
  }
  func.func @transform_9(%arg0: i32) -> (i32, i32) {
    %c0_i32 = arith.constant 0 : i32
    %c0_i32_0 = arith.constant 0 : i32
    %c0_i32_1 = arith.constant 0 : i32
    return %c0_i32, %c0_i32_0 : i32, i32
  }
  func.func @transform_10(%arg0: i32) -> (i32, i32) {
    %c0_i32 = arith.constant 0 : i32
    %c0_i32_0 = arith.constant 0 : i32
    %c0_i32_1 = arith.constant 0 : i32
    return %c0_i32, %c0_i32_0 : i32, i32
  }
  func.func @transform_11(%arg0: i32) -> (i32, i32) {
    %c0_i32 = arith.constant 0 : i32
    %c0_i32_0 = arith.constant 0 : i32
    %c0_i32_1 = arith.constant 0 : i32
    return %c0_i32, %c0_i32_0 : i32, i32
  }
  func.func @transform_12(%arg0: i32) -> (i32, i32) {
    %c0_i32 = arith.constant 0 : i32
    %c0_i32_0 = arith.constant 0 : i32
    %c0_i32_1 = arith.constant 0 : i32
    return %c0_i32, %c0_i32_0 : i32, i32
  }
  func.func @transform_13(%arg0: i32) -> (i32, i32) {
    %c0_i32 = arith.constant 0 : i32
    %c0_i32_0 = arith.constant 0 : i32
    %c0_i32_1 = arith.constant 0 : i32
    return %c0_i32, %c0_i32_0 : i32, i32
  }
  func.func @transform_14(%arg0: i32) -> (i32, i32) {
    %c0_i32 = arith.constant 0 : i32
    %c0_i32_0 = arith.constant 0 : i32
    %c0_i32_1 = arith.constant 0 : i32
    return %c0_i32, %c0_i32_0 : i32, i32
  }
  func.func @transform_15(%arg0: i32) -> (i32, i32) {
    %c0_i32 = arith.constant 0 : i32
    %c0_i32_0 = arith.constant 0 : i32
    %c0_i32_1 = arith.constant 0 : i32
    return %c0_i32, %c0_i32_0 : i32, i32
  }
}

</mosaic_0001>

<bundles_post_ra>
// kernel: nel_forward.1
= control target key start
LH: loop header
LB: loop body
LE: loop exit
PB: predicated region body
PF: predicated region fallthrough
CT: control target
= control target key end

     0   :  { %21 = vsyncpa [#allocation3], 0  ;;  %s2376_s0 = inlined_call_operand.vmem [shape: f32[32,128], index: 0, kind: input, shape index: {}]   ;;  %s2377_s1 = inlined_call_operand.vmem [shape: f32[32,128], index: 1, kind: input, shape index: {}]   ;;  %s2378_s2 = inlined_call_operand.vmem [shape: s32[4,8], index: 2, kind: input, shape index: {}]   ;;  %s2379_s3 = inlined_call_operand.vmem [shape: s32[4,8], index: 3, kind: input, shape index: {}]   ;;  %s2380_s4 = inlined_call_operand.vmem [shape: s32[4,8], index: 4, kind: input, shape index: {}]   ;;  %s2381_s5 = inlined_call_operand.hbm [shape: f32[128,128], index: 5, kind: input, shape index: {}]   ;;  %s2382_s6 = inlined_call_operand.vmem [shape: f32[1,128], index: 6, kind: input, shape index: {}]   ;;  %s2383_s7 = inlined_call_operand.vmem [shape: f32[1,128], index: 7, kind: input, shape index: {}]   ;;  %s2384_s8 = inlined_call_operand.hbm [shape: f32[1,128], index: 8, kind: input, shape index: {}]   ;;  %s2385_s9 = inlined_call_operand.hbm [shape: f32[128,128], index: 9, kind: input, shape index: {}]   ;;  %s2386_s10 = inlined_call_operand.hbm [shape: f32[128,128], index: 10, kind: input, shape index: {}]   ;;  %s2387_s11 = inlined_call_operand.hbm [shape: f32[1,128], index: 11, kind: input, shape index: {}]   ;;  %s2388_s12 = inlined_call_operand.vmem [shape: f32[4,128], index: 12, kind: output, shape index: {0}]   ;;  %s2389_s13 = inlined_call_operand.vmem [shape: f32[4,128], index: 13, kind: output, shape index: {1}]   ;;  %s2390_s14 = inlined_call_operand.hbm [shape: f32[4,128], index: 14, kind: output, shape index: {2}]   ;;  %s2391_s15 = inlined_call_operand.hbm [shape: f32[4,128], index: 15, kind: output, shape index: {3}]  }
   0x1   :  { %22 = vsyncpa [#allocation6], 0 }
   0x2   :  { %23 = vsyncpa [#allocation9], 0 }
   0x3   :  { %24 = vsyncpa [#allocation4], 0 }
   0x4   :  { %25 = vsyncpa [#allocation13], 0  ;;  %s1827_s18 = smov [#allocation5]   ;;  %s1663_s22 = scalar_lea.hbm %s2384_s8, 16 }
   0x5   :  { %s58_s19 = sshll.u32 %s1827_s18, 4  ;;  %p1664_p0 = scmp.ne.s32.totalorder %s2384_s8, %s1663_s22  ;;  %s59_s19 = int_to_ptr.vmem [resolvable:$true] %s58_s19 }
   0x6   :  { %p1667_p1 = scmp.lt.u32.totalorder %s1663_s22, %s2384_s8 }
   0x8   :  { %p1669_p2 = pnand %p1667_p1, %p1664_p0 }
   0xa   :  { %1672 = shalt.err (!%p1669_p2)
}
   0xb   :  { %s1673_s27 = scalar_lea.vmem %s59_s19, 16  ;;  %s1677_s28 = scalar_lea.vmem %s59_s19, 32 }
   0xc   :  { %p1674_p3 = scmp.ne.s32.totalorder %s59_s19, %s1673_s27  ;;  %p1678_p4 = scmp.lt.s32.totalorder %s59_s19, %s59_s19 }
   0xd   :  { %p1679_p5 = scmp.lt.s32.totalorder %s1677_s28, %s1673_s27 }
   0xf   :  { %p1680_p6 = por %p1679_p5, %p1678_p4 }
  0x11   :  { %p1681_p7 = pnand %p1680_p6, %p1674_p3 }
  0x13   :  { %1684 = shalt.err (!%p1681_p7)
}
  0x14   :  { %61 = dma.hbm_to_vmem [thread:$0]  %s2384_s8, 16, %s59_s19, [#allocation6]  }
  0x15   :  { %s1828_s16 = smov [#allocation8]   ;;  %s1829_s18 = smov [#allocation2]  }
  0x16   :  { %s79_s17 = sshll.u32 %s1828_s16, 4  ;;  %s41_s20 = sshll.u32 %s1829_s18, 4  ;;  %s80_s17 = int_to_ptr.vmem [resolvable:$true] %s79_s17  ;;  %s42_s20 = int_to_ptr.vmem [resolvable:$true] %s41_s20 }
  0x17   :  { %s1685_s23 = scalar_lea.hbm %s2386_s10, 2048 }
  0x18   :  { %p1686_p8 = scmp.ne.s32.totalorder %s2386_s10, %s1685_s23  ;;  %p1689_p9 = scmp.lt.u32.totalorder %s1685_s23, %s2386_s10 }
  0x1a   :  { %p1691_p10 = pnand %p1689_p9, %p1686_p8 }
  0x1c   :  { %1694 = shalt.err (!%p1691_p10)
}
  0x1d   :  { %s1695_s8 = scalar_lea.vmem %s80_s17, 2048  ;;  %p1700_p12 = scmp.lt.s32.totalorder %s80_s17, %s80_s17 }
  0x1e   :  { %p1696_p11 = scmp.ne.s32.totalorder %s80_s17, %s1695_s8  ;;  %p1701_p13 = scmp.lt.s32.totalorder %s1695_s8, %s1695_s8 }
  0x20   :  { %p1702_p0 = por %p1701_p13, %p1700_p12 }
  0x22   :  { %p1703_p1 = pnand %p1702_p0, %p1696_p11 }
  0x24   :  { %1706 = shalt.err (!%p1703_p1)
}
  0x25   :  { %s1830_s19 = smov 128   ;;  %s1831_s28 = smov 8  }
  0x26   :  { %85 = dma.hbm_to_vmem [thread:$0]  %s2386_s10, 2048, %s80_s17, [#allocation9], %s1830_s19, %s1830_s19, %s1831_s28  }
  0x27   :  { %s1707_s21 = scalar_lea.hbm %s2381_s5, 2048 }
  0x28   :  { %p1708_p2 = scmp.ne.s32.totalorder %s2381_s5, %s1707_s21  ;;  %p1711_p3 = scmp.lt.u32.totalorder %s1707_s21, %s2381_s5 }
  0x2a   :  { %p1713_p4 = pnand %p1711_p3, %p1708_p2 }
  0x2c   :  { %1716 = shalt.err (!%p1713_p4)
}
  0x2d   :  { %s1717_s26 = scalar_lea.vmem %s42_s20, 2048  ;;  %p1722_p6 = scmp.lt.s32.totalorder %s42_s20, %s42_s20 }
  0x2e   :  { %p1718_p5 = scmp.ne.s32.totalorder %s42_s20, %s1717_s26  ;;  %p1723_p7 = scmp.lt.s32.totalorder %s1717_s26, %s1717_s26 }
  0x30   :  { %p1724_p8 = por %p1723_p7, %p1722_p6 }
  0x32   :  { %p1725_p9 = pnand %p1724_p8, %p1718_p5 }
  0x34   :  { %1728 = shalt.err (!%p1725_p9)
}
  0x35   :  { %47 = dma.hbm_to_vmem [thread:$0]  %s2381_s5, 2048, %s42_s20, [#allocation3], %s1830_s19, %s1830_s19, %s1831_s28  }
  0x36   :  { %s1832_s27 = smov [#allocation7]   ;;  %s1833_s29 = smov [#allocation10]  }
  0x37   :  { %s67_s8 = sshll.u32 %s1832_s27, 4  ;;  %s92_s30 = sshll.u32 %s1833_s29, 4  ;;  %s68_s8 = int_to_ptr.vmem [resolvable:$true] %s67_s8  ;;  %s93_s30 = int_to_ptr.vmem [resolvable:$true] %s92_s30 }
  0x38   :  { %s1729_s21 = scalar_lea.hbm %s2385_s9, 2048 }
  0x39   :  { %p1730_p10 = scmp.ne.s32.totalorder %s2385_s9, %s1729_s21  ;;  %p1733_p11 = scmp.lt.u32.totalorder %s1729_s21, %s2385_s9 }
  0x3b   :  { %p1735_p12 = pnand %p1733_p11, %p1730_p10 }
  0x3d   :  { %1738 = shalt.err (!%p1735_p12)
}
  0x3e   :  { %s1739_s5 = scalar_lea.vmem %s68_s8, 2048  ;;  %p1744_p0 = scmp.lt.s32.totalorder %s68_s8, %s68_s8 }
  0x3f   :  { %p1740_p13 = scmp.ne.s32.totalorder %s68_s8, %s1739_s5  ;;  %p1745_p1 = scmp.lt.s32.totalorder %s1739_s5, %s1739_s5 }
  0x41   :  { %p1746_p2 = por %p1745_p1, %p1744_p0 }
  0x43   :  { %p1747_p3 = pnand %p1746_p2, %p1740_p13 }
  0x45   :  { %1750 = shalt.err (!%p1747_p3)
}
  0x46   :  { %73 = dma.hbm_to_vmem [thread:$0]  %s2385_s9, 2048, %s68_s8, [#allocation6], %s1830_s19, %s1830_s19, %s1831_s28  }
  0x47   :  { %s1751_s27 = scalar_lea.hbm %s2387_s11, 16 }
  0x48   :  { %p1752_p4 = scmp.ne.s32.totalorder %s2387_s11, %s1751_s27  ;;  %p1755_p5 = scmp.lt.u32.totalorder %s1751_s27, %s2387_s11 }
  0x4a   :  { %p1757_p6 = pnand %p1755_p5, %p1752_p4 }
  0x4c   :  { %1760 = shalt.err (!%p1757_p6)
}
  0x4d   :  { %s1761_s22 = scalar_lea.vmem %s93_s30, 16  ;;  %s1765_s23 = scalar_lea.vmem %s93_s30, 32 }
  0x4e   :  { %p1762_p7 = scmp.ne.s32.totalorder %s93_s30, %s1761_s22  ;;  %p1766_p8 = scmp.lt.s32.totalorder %s93_s30, %s93_s30 }
  0x4f   :  { %p1767_p9 = scmp.lt.s32.totalorder %s1765_s23, %s1761_s22 }
  0x51   :  { %p1768_p10 = por %p1767_p9, %p1766_p8 }
  0x53   :  { %p1769_p11 = pnand %p1768_p10, %p1762_p7 }
  0x55   :  { %1772 = shalt.err (!%p1769_p11)
}
  0x56   :  { %95 = dma.hbm_to_vmem [thread:$0]  %s2387_s11, 16, %s93_s30, [#allocation9]  }
  0x57   :  { %1817 = dma.done.wait [#allocation3], 2048  }
  0x58   :  { %1818 = vsyncadd [#allocation3], 4294965248 }
  0x59   :  { %1819 = dma.done.wait [#allocation6], 2064  }
  0x5a   :  { %1820 = vsyncadd [#allocation6], 4294965232 }
  0x5b   :  { %1821 = dma.done.wait [#allocation9], 2064  }
  0x5c   :  { %1822 = vsyncadd [#allocation9], 4294965232  ;;  %v111_v0 = vld [vmem:[#allocation2] sm:$0xff]  ;;  %v112_v1 = vld [vmem:[#allocation2 + $0x8] sm:$0xff]  ;;  %v2392_v57 = vmov 0.0   ;;  %vm505_vm1 = vcmask 60416   ;;  %v449_v63 = vlaneseq }
  0x5d   :  { %v113_v2 = vld [vmem:[#allocation2 + $0x10] sm:$0xff]  ;;  %v1451_v3 = vpack.c.bf16 %v112_v1, %v111_v0  ;;  %v114_v4 = vld [vmem:[#allocation2 + $0x18] sm:$0xff]  ;;  %v115_v6 = vld [vmem:[#allocation2 + $0x20] sm:$0xff]  ;;  %vm1836_vm3 = vmmov 0   ;;  %vm715_vm4 = vcmask 1041409   ;;  %vm718_vm5 = vcmask 1042434  }
  0x5e   :  { %v1455_v5 = vpack.c.bf16 %v114_v4, %v113_v2  ;;  %v116_v7 = vld [vmem:[#allocation2 + $0x28] sm:$0xff]  ;;  %v130_v9 = vld [vmem:[%s2376_s0] sm:$0xff]  ;;  %v117_v10 = vld [vmem:[#allocation2 + $0x30] sm:$0xff]  ;;  %v450_v0 = vshrl.u32 %v449_v63, 7  ;;  %vm721_vm6 = vcmask 1043459   ;;  %s1838_s28 = smov [#allocation12]  }
  0x5f   :  { %1452 = vmatprep.subr.bf16.mxu0 %v1451_v3  ;;  %1484 = vmatprep.subr.bf16.mxu1 %v1451_v3  ;;  %v1459_v8 = vpack.c.bf16 %v116_v7, %v115_v6  ;;  %v118_v11 = vld [vmem:[#allocation2 + $0x38] sm:$0xff]  ;;  %v294_v12 = vld [vmem:[%s2377_s1] sm:$0xff]  ;;  %v120_v15 = vld [vmem:[#allocation2 + $0x48] sm:$0xff]  ;;  %s1102_s8 = sshll.u32 %s1838_s28, 4  ;;  %s1103_s8 = int_to_ptr.vmem [resolvable:$true] %s1102_s8 }
  0x60   :  { %1454 = vmatpush3.bf16.msra.mxu0 %v1451_v3  ;;  %1486 = vmatpush3.bf16.msra.mxu1 %v1451_v3  ;;  %v1463_v13 = vpack.c.bf16 %v118_v11, %v117_v10  ;;  %v119_v14 = vld [vmem:[#allocation2 + $0x40] sm:$0xff]  ;;  %v121_v17 = vld [vmem:[#allocation2 + $0x50] sm:$0xff]  ;;  %v122_v18 = vld [vmem:[#allocation2 + $0x58] sm:$0xff]  ;;  %v458_v1 = vsub.s32 1, %v450_v0  ;;  %v465_v3 = vsub.s32 2, %v450_v0  ;;  %v2064_v6 = vsub.s32 3, %v450_v0 }
  0x61   :  { %1456 = vmatprep.subr.bf16.mxu0 %v1455_v5  ;;  %1488 = vmatprep.subr.bf16.mxu1 %v1455_v5  ;;  %v1467_v16 = vpack.c.bf16 %v120_v15, %v119_v14  ;;  %v1471_v19 = vpack.c.bf16 %v122_v18, %v121_v17  ;;  %v123_v20 = vld [vmem:[#allocation2 + $0x60] sm:$0xff]  ;;  %v124_v21 = vld [vmem:[#allocation2 + $0x68] sm:$0xff]  ;;  %v125_v23 = vld [vmem:[#allocation2 + $0x70] sm:$0xff] }
  0x62   :  { %1267 = vmatprep.mubr.f32.mxu0 %v130_v9  ;;  %1305 = vmatprep.mubr.f32.mxu1 %v294_v12  ;;  %v1475_v22 = vpack.c.bf16 %v124_v21, %v123_v20  ;;  %v126_v24 = vld [vmem:[#allocation2 + $0x78] sm:$0xff]  ;;  %v131_v26 = vld [vmem:[%s2376_s0 + $0x8] sm:$0xff]  ;;  %v132_v28 = vld [vmem:[%s2376_s0 + $0x10] sm:$0xff] }
  0x63   :  { %v1479_v25 = vpack.c.bf16 %v126_v24, %v125_v23  ;;  %v295_v27 = vld [vmem:[%s2377_s1 + $0x8] sm:$0xff]  ;;  %v296_v29 = vld [vmem:[%s2377_s1 + $0x10] sm:$0xff]  ;;  %v133_v30 = vld [vmem:[%s2376_s0 + $0x18] sm:$0xff] }
  0x64   :  { %1458 = vmatpush3.bf16.msra.mxu0 %v1455_v5  ;;  %1490 = vmatpush3.bf16.msra.mxu1 %v1455_v5  ;;  %v297_v31 = vld [vmem:[%s2377_s1 + $0x18] sm:$0xff]  ;;  %v1121_v32 = vld [vmem:[%s2382_s6] ss:$0 sm:$0xff]  ;;  %v757_v63 = vld [vmem:[#allocation8 + $0x20] sm:$0xff] }
  0x65   :  { %1460 = vmatprep.subr.bf16.mxu0 %v1459_v8  ;;  %1492 = vmatprep.subr.bf16.mxu1 %v1459_v8  ;;  %v439_v50 = vld [vmem:[%s2378_s2] sm:$0xf] }
  0x66   :  { %v441_v51 = vld [vmem:[%s2379_s3] sm:$0xf]  ;;  %v440_v61 = vcvt.s32.f32 %v439_v50 }
  0x67   :  { %vm442_vm0 = vcmp.ne.s32.totalorder %v441_v51, %v439_v50  ;;  %v445_v12 = vld [vmem:[%s2380_s4] sm:$0xf] }
  0x68   :  { %1462 = vmatpush3.bf16.msra.mxu0 %v1459_v8  ;;  %1494 = vmatpush3.bf16.msra.mxu1 %v1459_v8  ;;  %v2050_v58 = vsel %vm442_vm0, 1.0, %v2392_v57  ;;  %v506_v62 = vsel %vm505_vm1, %v440_v61, 0.0  ;;  %v466_v4 = vrot.slane %v440_v61, %v465_v3  ;;  %v459_v7 = vrot.slane %v440_v61, %v458_v1 }
  0x69   :  { %1464 = vmatprep.subr.bf16.mxu0 %v1463_v13  ;;  %1496 = vmatprep.subr.bf16.mxu1 %v1463_v13  ;;  %v614_v60 = vsel %vm505_vm1, %v2050_v58, 0.0  ;;  %v568_v2 = vrot.slane %v2050_v58, %v458_v1  ;;  %v575_v5 = vrot.slane %v2050_v58, %v465_v3  ;;  %v451_v8 = vsub.s32 0, %v450_v0  ;;  %v758_v0 = vld [vmem:[#allocation8 + $0x28] sm:$0xff] }
  0x6a   :  { %v473_v9 = vrot.slane %v440_v61, %v2064_v6  ;;  %vm446_vm2 = vcmp.ne.s32.totalorder %v445_v12, %v439_v50  ;;  %v737_v50 = vld [vmem:[#allocation7] sm:$0xff]  ;;  %v744_v12 = vld [vmem:[#allocation7 + $0x38] sm:$0xff] }
  0x6b   :  { %v452_v10 = vrot.slane %v440_v61, %v451_v8  ;;  %v2076_v14 = vsel %vm446_vm2, 1.0, %v2392_v57 }
  0x6c   :  { %1466 = vmatpush3.bf16.msra.mxu0 %v1463_v13  ;;  %1498 = vmatpush3.bf16.msra.mxu1 %v1463_v13  ;;  %v582_v13 = vrot.slane %v2050_v58, %v2064_v6  ;;  %v644_v15 = vrot.slane %v2076_v14, %v458_v1  ;;  %v741_v1 = vld [vmem:[#allocation7 + $0x20] sm:$0xff] }
  0x6d   :  { %1468 = vmatprep.subr.bf16.mxu0 %v1467_v16  ;;  %1500 = vmatprep.subr.bf16.mxu1 %v1467_v16 }
  0x70   :  { %1470 = vmatpush3.bf16.msra.mxu0 %v1467_v16  ;;  %1502 = vmatpush3.bf16.msra.mxu1 %v1467_v16  ;;  %v651_v16 = vrot.slane %v2076_v14, %v465_v3  ;;  %v742_v3 = vld [vmem:[#allocation7 + $0x28] sm:$0xff] }
  0x71   :  { %1472 = vmatprep.subr.bf16.mxu0 %v1471_v19  ;;  %1504 = vmatprep.subr.bf16.mxu1 %v1471_v19 }
  0x74   :  { %1474 = vmatpush3.bf16.msra.mxu0 %v1471_v19  ;;  %1506 = vmatpush3.bf16.msra.mxu1 %v1471_v19 }
  0x75   :  { %1476 = vmatprep.subr.bf16.mxu0 %v1475_v22  ;;  %1508 = vmatprep.subr.bf16.mxu1 %v1475_v22 }
  0x78   :  { %1478 = vmatpush3.bf16.msra.mxu0 %v1475_v22  ;;  %1510 = vmatpush3.bf16.msra.mxu1 %v1475_v22 }
  0x79   :  { %1480 = vmatprep.subr.bf16.mxu0 %v1479_v25  ;;  %1512 = vmatprep.subr.bf16.mxu1 %v1479_v25 }
  0x7c   :  { %1482 = vmatpush3.bf16.msra.mxu0 %v1479_v25  ;;  %1514 = vmatpush3.bf16.msra.mxu1 %v1479_v25 }
  0x7f   :  { %1268 = vmatmul.mubr.f32.vlgmr.msra.gmra.mrb[0].mxu0 %v131_v26  ;;  %1306 = vmatmul.mubr.f32.vlgmr.msra.gmra.mrb[0].mxu1 %v295_v27 }
  0x80   :  { %1270 = vmatprep.mubr.f32.mxu0 %v132_v28  ;;  %1308 = vmatprep.mubr.f32.mxu1 %v296_v29 }
  0x83   :  { %1271 = vmatmul.mubr.f32.gmra.mrb[2].mxu0 %v133_v30  ;;  %1309 = vmatmul.mubr.f32.gmra.mrb[2].mxu1 %v297_v31 }
  0x84   :  { %1343 = vmatprep.mubr.msk.f32.mxu0 %vm1836_vm3, %v2392_v57  ;;  %1378 = vmatprep.mubr.msk.f32.mxu1 %vm1836_vm3, %v2392_v57 }
 0x152   :  { %v1269_v33 = vpop.f32.mrb[0].mxu0  ;;  %v1307_v34 = vpop.f32.mrb[0].mxu1 }
 0x153   :  { %v2015_v35 = vadd.f32 %v1269_v33, %v1121_v32  ;;  %v206_v36 = vpop.f32.mrb[1].mxu0  ;;  %v2017_v37 = vadd.f32 %v1307_v34, %v1121_v32  ;;  %v364_v38 = vpop.f32.mrb[1].mxu1 }
 0x154   :  { %v2019_v39 = vadd.f32 %v1121_v32, %v206_v36  ;;  %v2046_v55 = vadd.f32 %v1121_v32, %v364_v38 }
 0x155   :  { %v226_v40 = vmax.f32 %v2015_v35, 0.0  ;;  %v384_v45 = vmax.f32 %v2017_v37, 0.0 }
 0x156   :  { %v225_v41 = vmax.f32 %v2019_v39, 0.0  ;;  %v1272_v42 = vpop.f32.mrb[2].mxu0  ;;  %v1310_v43 = vpop.f32.mrb[2].mxu1  ;;  %v383_v59 = vmax.f32 %v2046_v55, 0.0  ;;  %v755_v55 = vld [vmem:[#allocation8 + $0x10] sm:$0xff] }
 0x157   :  { %v2023_v44 = vadd.f32 %v1272_v42, %v1121_v32  ;;  %231 = vadd.xlane.f32.xlu0 %v226_v40  ;;  %v216_v46 = vpop.f32.mrb[3].mxu0  ;;  %v374_v47 = vpop.f32.mrb[3].mxu1  ;;  %v2030_v48 = vadd.f32 %v1310_v43, %v1121_v32 }
 0x158   :  { %229 = vadd.xlane.f32.xlu1 %v225_v41  ;;  %v2032_v49 = vadd.f32 %v1121_v32, %v374_v47  ;;  %v2041_v53 = vadd.f32 %v1121_v32, %v216_v46  ;;  %v561_v46 = vrot.slane %v2050_v58, %v451_v8  ;;  %v753_v47 = vld [vmem:[#allocation8] sm:$0xff]  ;;  %v739_v58 = vld [vmem:[#allocation7 + $0x10] sm:$0xff] }
 0x159   :  { %v228_v52 = vmax.f32 %v2023_v44, 0.0  ;;  %v386_v54 = vmax.f32 %v2030_v48, 0.0  ;;  %v754_v48 = vld [vmem:[#allocation8 + $0x8] sm:$0xff] }
 0x15a   :  { %v227_v56 = vmax.f32 %v2041_v53, 0.0  ;;  %v385_v11 = vmax.f32 %v2032_v49, 0.0  ;;  %v2122_v51 = vpack.c.bf16 %v754_v48, %v753_v47  ;;  %v2394_v53 = vmov 0.0|0.0  }
 0x15b   :  { %389 = vadd.xlane.f32.xlu0 %v384_v45  ;;  %1515 = vmatprep.subr.bf16.mxu0 %v2394_v53 }
 0x15c   :  { %235 = vadd.xlane.f32.xlu1 %v228_v52  ;;  %1539 = vmatprep.subr.bf16.mxu1 %v2394_v53 }
 0x15d   :  { %1517 = vmatpush3.bf16.msra.mxu0 %v2122_v51 }
 0x15e   :  { %1518 = vmatprep.subr.bf16.mxu0 %v2394_v53 }
 0x15f   :  { %233 = vadd.xlane.f32.xlu0 %v227_v56 }
 0x160   :  { %393 = vadd.xlane.f32.xlu1 %v386_v54 }
 0x163   :  { %387 = vadd.xlane.f32.xlu0 %v383_v59 }
 0x164   :  { %615 = vadd.xlane.f32.xlu1 %v614_v60  ;;  %v740_v60 = vld [vmem:[#allocation7 + $0x18] sm:$0xff] }
 0x165   :  { %v2134_v61 = vpack.c.bf16 %v740_v60, %v739_v58  ;;  %v658_v60 = vrot.slane %v2076_v14, %v2064_v6 }
 0x167   :  { %507 = vadd.xlane.f32.xlu0 %v506_v62 }
 0x175   :  { %570 = vbcast.lane.b32.xlu1 %v568_v2, 256  ;;  %v2142_v2 = vpack.c.bf16 %v758_v0, %v757_v63 }
 0x179   :  { %468 = vbcast.lane.b32.xlu1 %v466_v4, 256  ;;  %v2144_v4 = vpack.c.bf16 %v742_v3, %v741_v1 }
 0x17d   :  { %577 = vbcast.lane.b32.xlu1 %v575_v5, 256  ;;  %461 = vbcast.lane.b32.xlu0 %v459_v7, 256  ;;  %v759_v5 = vld [vmem:[#allocation8 + $0x30] sm:$0xff]  ;;  %v760_v7 = vld [vmem:[#allocation8 + $0x38] sm:$0xff] }
 0x181   :  { %475 = vbcast.lane.b32.xlu1 %v473_v9, 256  ;;  %454 = vbcast.lane.b32.xlu0 %v452_v10, 256  ;;  %v2152_v10 = vpack.c.bf16 %v760_v7, %v759_v5 }
 0x1a5   :  { %391 = vadd.xlane.f32.xlu1 %v385_v11 }
 0x1b6   :  { %584 = vbcast.lane.b32.xlu1 %v582_v13, 256 }
 0x1ba   :  { %646 = vbcast.lane.b32.xlu1 %v644_v15, 256  ;;  %v761_v15 = vld [vmem:[#allocation8 + $0x40] sm:$0xff] }
 0x1be   :  { %653 = vbcast.lane.b32.xlu1 %v651_v16, 256  ;;  %v762_v16 = vld [vmem:[#allocation8 + $0x48] sm:$0xff] }
 0x1e4   :  { %v232_v17 = vpop.xlane.xlu0 %231 }
 0x1e5   :  { %v239_v18 = vmul.f32 0.0078125, %v232_v17  ;;  %v230_v19 = vpop.xlane.xlu1 %229  ;;  %v745_v17 = vld [vmem:[#allocation7 + $0x40] sm:$0xff] }
 0x1e6   :  { %v238_v22 = vmul.f32 0.0078125, %v230_v19  ;;  %v746_v19 = vld [vmem:[#allocation7 + $0x48] sm:$0xff] }
 0x1e7   :  { %v2082_v20 = vsub.f32 %v226_v40, %v239_v18  ;;  %v2160_v18 = vpack.c.bf16 %v762_v16, %v761_v15 }
 0x1e8   :  { %v390_v21 = vpop.xlane.xlu0 %389  ;;  %v2094_v30 = vsub.f32 %v225_v41, %v238_v22 }
 0x1e9   :  { %v396_v23 = vmul.f32 0.0078125, %v390_v21  ;;  %v236_v24 = vpop.xlane.xlu1 %235  ;;  %v247_v25 = vmul.f32 %v2082_v20, %v2082_v20  ;;  %v2162_v21 = vpack.c.bf16 %v746_v19, %v745_v17 }
 0x1ea   :  { %v241_v26 = vmul.f32 0.0078125, %v236_v24  ;;  %v246_v39 = vmul.f32 %v2094_v30, %v2094_v30  ;;  %v764_v24 = vld [vmem:[#allocation8 + $0x58] sm:$0xff] }
 0x1eb   :  { %v2088_v27 = vsub.f32 %v384_v45, %v396_v23  ;;  %252 = vadd.xlane.f32.xlu0 %v247_v25  ;;  %v637_v45 = vrot.slane %v2076_v14, %v451_v8  ;;  %v743_v8 = vld [vmem:[#allocation7 + $0x30] sm:$0xff] }
 0x1ec   :  { %v2090_v28 = vsub.f32 %v228_v52, %v241_v26  ;;  %v234_v29 = vpop.xlane.xlu0 %233  ;;  %v738_v52 = vld [vmem:[#allocation7 + $0x8] sm:$0xff]  ;;  %v2154_v13 = vpack.c.bf16 %v744_v12, %v743_v8  ;;  %v763_v23 = vld [vmem:[#allocation8 + $0x50] sm:$0xff] }
 0x1ed   :  { %v394_v31 = vpop.xlane.xlu1 %393  ;;  %v404_v32 = vmul.f32 %v2088_v27, %v2088_v27  ;;  %v240_v33 = vmul.f32 0.0078125, %v234_v29  ;;  %v747_v25 = vld [vmem:[#allocation7 + $0x50] sm:$0xff]  ;;  %v2170_v26 = vpack.c.bf16 %v764_v24, %v763_v23  ;;  %v748_v29 = vld [vmem:[#allocation7 + $0x58] sm:$0xff] }
 0x1ee   :  { %v398_v34 = vmul.f32 0.0078125, %v394_v31  ;;  %v249_v35 = vmul.f32 %v2090_v28, %v2090_v28  ;;  %v2172_v31 = vpack.c.bf16 %v748_v29, %v747_v25 }
 0x1ef   :  { %409 = vadd.xlane.f32.xlu0 %v404_v32  ;;  %v2108_v40 = vsub.f32 %v227_v56, %v240_v33  ;;  %v756_v56 = vld [vmem:[#allocation8 + $0x18] sm:$0xff]  ;;  %v765_v32 = vld [vmem:[#allocation8 + $0x60] sm:$0xff]  ;;  %v766_v33 = vld [vmem:[#allocation8 + $0x68] sm:$0xff] }
 0x1f0   :  { %v2102_v36 = vsub.f32 %v386_v54, %v398_v34  ;;  %v388_v37 = vpop.xlane.xlu0 %387  ;;  %256 = vadd.xlane.f32.xlu1 %v249_v35  ;;  %v2126_v54 = vpack.c.bf16 %v738_v52, %v737_v50  ;;  %v749_v34 = vld [vmem:[#allocation7 + $0x60] sm:$0xff]  ;;  %v2177_v35 = vpack.c.bf16 %v766_v33, %v765_v32 }
 0x1f1   :  { %v395_v38 = vmul.f32 0.0078125, %v388_v37  ;;  %v248_v44 = vmul.f32 %v2108_v40, %v2108_v40  ;;  %v2136_v62 = vpop.xlane.xlu1 %615  ;;  %v750_v37 = vld [vmem:[#allocation7 + $0x68] sm:$0xff] }
 0x1f2   :  { %v406_v41 = vmul.f32 %v2102_v36, %v2102_v36  ;;  %1541 = vmatpush3.bf16.msra.mxu1 %v2126_v54 }
 0x1f3   :  { %v2114_v42 = vsub.f32 %v383_v59, %v395_v38  ;;  %250 = vadd.xlane.f32.xlu0 %v246_v39  ;;  %1542 = vmatprep.subr.bf16.mxu1 %v2394_v53  ;;  %v2132_v59 = vpack.c.bf16 %v756_v56, %v755_v55  ;;  %v767_v38 = vld [vmem:[#allocation8 + $0x70] sm:$0xff]  ;;  %v768_v39 = vld [vmem:[#allocation8 + $0x78] sm:$0xff] }
 0x1f4   :  { %413 = vadd.xlane.f32.xlu1 %v406_v41  ;;  %v2191_v47 = vpack.c.bf16 %v768_v39, %v767_v38  ;;  %v508_v63 = vpop.xlane.xlu0 %507  ;;  %v2225_v39 = vld [vmem:[%s2383_s7] ss:$0 sm:$0xff]  ;;  %s1837_s7 = smov [#allocation11]  }
 0x1f5   :  { %v403_v43 = vmul.f32 %v2114_v42, %v2114_v42  ;;  %1520 = vmatpush3.bf16.msra.mxu0 %v2132_v59  ;;  %v2149_v9 = vpop.permute.xlu1 %570  ;;  %2406 = vst [vmem:[#allocation24_spill] sm:$0xff] %v2225_v39  ;;  %s1092_s11 = sshll.u32 %s1837_s7, 4  ;;  %s1093_s11 = int_to_ptr.vmem [resolvable:$true] %s1092_s11 }
 0x1f6   :  { %1544 = vmatpush3.bf16.msra.mxu1 %v2134_v61  ;;  %1521 = vmatprep.subr.bf16.mxu0 %v2394_v53  ;;  %2402 = vst [vmem:[#allocation20_spill] sm:$0xff] %v2191_v47  ;;  %s1773_s30 = scalar_lea.vmem %s1093_s11, 64  ;;  %p1778_p13 = scmp.lt.s32.totalorder %s1093_s11, %s1093_s11 }
 0x1f7   :  { %407 = vadd.xlane.f32.xlu0 %v403_v43  ;;  %1545 = vmatprep.subr.bf16.mxu1 %v2394_v53  ;;  %v2182_v43 = vpack.c.bf16 %v750_v37, %v749_v34  ;;  %p1774_p12 = scmp.ne.s32.totalorder %s1093_s11, %s1773_s30  ;;  %p1779_p0 = scmp.lt.s32.totalorder %s1773_s30, %s1773_s30 }
 0x1f8   :  { %254 = vadd.xlane.f32.xlu1 %v248_v44  ;;  %v751_v44 = vld [vmem:[#allocation7 + $0x70] sm:$0xff]  ;;  %v2214_v1 = vpop.permute.xlu0 %461 }
 0x1f9   :  { %1523 = vmatpush3.bf16.msra.mxu0 %v2142_v2  ;;  %v2164_v22 = vpop.permute.xlu1 %468  ;;  %p1780_p1 = por %p1779_p0, %p1778_p13 }
 0x1fa   :  { %1547 = vmatpush3.bf16.msra.mxu1 %v2144_v4  ;;  %1524 = vmatprep.subr.bf16.mxu0 %v2394_v53  ;;  %2401 = vst [vmem:[#allocation19_spill] sm:$0xff] %v2164_v22 }
 0x1fb   :  { %1548 = vmatprep.subr.bf16.mxu1 %v2394_v53  ;;  %p1781_p2 = pnand %p1780_p1, %p1774_p12 }
 0x1fc   :  { %v2218_v5 = vpop.permute.xlu0 %454 }
 0x1fd   :  { %1526 = vmatpush3.bf16.msra.mxu0 %v2152_v10  ;;  %v2179_v41 = vpop.permute.xlu1 %577 }
 0x1fe   :  { %1550 = vmatpush3.bf16.msra.mxu1 %v2154_v13  ;;  %1527 = vmatprep.subr.bf16.mxu0 %v2394_v53 }
 0x1ff   :  { %1551 = vmatprep.subr.bf16.mxu1 %v2394_v53 }
 0x201   :  { %1529 = vmatpush3.bf16.msra.mxu0 %v2160_v18  ;;  %v2198_v50 = vpop.permute.xlu1 %475 }
 0x202   :  { %1553 = vmatpush3.bf16.msra.mxu1 %v2162_v21  ;;  %1530 = vmatprep.subr.bf16.mxu0 %v2394_v53 }
 0x203   :  { %1554 = vmatprep.subr.bf16.mxu1 %v2394_v53 }
 0x205   :  { %1532 = vmatpush3.bf16.msra.mxu0 %v2170_v26 }
 0x206   :  { %1556 = vmatpush3.bf16.msra.mxu1 %v2172_v31  ;;  %1533 = vmatprep.subr.bf16.mxu0 %v2394_v53 }
 0x207   :  { %1557 = vmatprep.subr.bf16.mxu1 %v2394_v53 }
 0x209   :  { %639 = vbcast.lane.b32.xlu1 %v637_v45, 256  ;;  %v752_v45 = vld [vmem:[#allocation7 + $0x78] sm:$0xff]  ;;  %1535 = vmatpush3.bf16.msra.mxu0 %v2177_v35 }
 0x20a   :  { %1559 = vmatpush3.bf16.msra.mxu1 %v2182_v43  ;;  %1536 = vmatprep.subr.bf16.mxu0 %v2394_v53  ;;  %v2195_v48 = vpack.c.bf16 %v752_v45, %v751_v44 }
 0x20b   :  { %1560 = vmatprep.subr.bf16.mxu1 %v2394_v53 }
 0x20c   :  { %2403 = vst [vmem:[#allocation21_spill] sm:$0xff] %v2195_v48 }
 0x20d   :  { %563 = vbcast.lane.b32.xlu0 %v561_v46, 256  ;;  %v690_v46 = vsel %vm505_vm1, %v2076_v14, 0.0  ;;  %1538 = vmatpush3.bf16.msra.mxu0 %v2191_v47 }
 0x20e   :  { %1562 = vmatpush3.bf16.msra.mxu1 %v2195_v48  ;;  %1563 = vmatprep.subr.bf16.mxu0 %v2394_v53 }
 0x20f   :  { %1587 = vmatprep.subr.bf16.mxu1 %v2394_v53 }
 0x22c   :  { %691 = vadd.xlane.f32.xlu0 %v690_v46 }
 0x232   :  { %v392_v52 = vpop.xlane.xlu1 %391 }
 0x233   :  { %v397_v55 = vmul.f32 0.0078125, %v392_v52  ;;  %v617_v52 = vmax.f32 %v2136_v62, 1.0 }
 0x235   :  { %v2206_v56 = vsub.f32 %v385_v11, %v397_v55  ;;  %v2229_v55 = vld [vmem:[#allocation5] ss:$0 sm:$0xff] }
 0x236   :  { %v2212_v0 = vpop.permute.xlu1 %584 }
 0x237   :  { %2404 = vst [vmem:[#allocation22_spill] sm:$0xff] %v2206_v56  ;;  %v405_v58 = vmul.f32 %v2206_v56, %v2206_v56 }
 0x239   :  { %411 = vadd.xlane.f32.xlu1 %v405_v58 }
 0x23a   :  { %v2216_v3 = vpop.permute.xlu1 %646 }
 0x23e   :  { %v2220_v11 = vpop.permute.xlu1 %653 }
 0x23f   :  { %2405 = vst [vmem:[#allocation23_spill] sm:$0xff] %v2220_v11 }
 0x24a   :  { %660 = vbcast.lane.b32.xlu1 %v658_v60, 256 }
 0x278   :  { %v253_v49 = vpop.xlane.xlu0 %252 }
 0x279   :  { %v259_v7 = vmul.f32 0.0078125, %v253_v49 }
 0x27b   :  { %v263_v8 = vadd.f32 1e-05, %v259_v7 }
 0x27c   :  { %v410_v12 = vpop.xlane.xlu0 %409 }
 0x27d   :  { %1623 = vrsqrt.f32 %v263_v8  ;;  %v416_v15 = vmul.f32 0.0078125, %v410_v12  ;;  %v257_v16 = vpop.xlane.xlu1 %256  ;;  %v619_v12 = vrot.slane %v617_v52, 1 }
 0x27e   :  { %v261_v6 = vmul.f32 0.0078125, %v257_v16 }
 0x27f   :  { %v420_v14 = vadd.f32 1e-05, %v416_v15  ;;  %v509_v15 = vmax.f32 %v508_v63, 1.0 }
 0x280   :  { %v265_v17 = vadd.f32 1e-05, %v261_v6  ;;  %v251_v19 = vpop.xlane.xlu0 %250 }
 0x281   :  { %v258_v23 = vmul.f32 0.0078125, %v251_v19  ;;  %v414_v24 = vpop.xlane.xlu1 %413  ;;  %v511_v63 = vrot.slane %v509_v15, 1 }
 0x282   :  { %1625 = vrsqrt.f32 %v265_v17  ;;  %v418_v32 = vmul.f32 0.0078125, %v414_v24  ;;  %v621_v17 = vrot.slane %v617_v52, 3 }
 0x283   :  { %1627 = vrsqrt.f32 %v420_v14  ;;  %v262_v25 = vadd.f32 1e-05, %v258_v23 }
 0x284   :  { %v408_v29 = vpop.xlane.xlu0 %407  ;;  %v422_v58 = vadd.f32 1e-05, %v418_v32  ;;  %v512_v32 = vrot.slane %v509_v15, 2 }
 0x285   :  { %1629 = vrsqrt.f32 %v262_v25  ;;  %v415_v33 = vmul.f32 0.0078125, %v408_v29  ;;  %v255_v34 = vpop.xlane.xlu1 %254 }
 0x286   :  { %v260_v37 = vmul.f32 0.0078125, %v255_v34 }
 0x287   :  { %v1624_v38 = vpop.eup %1623  ;;  %v419_v44 = vadd.f32 1e-05, %v415_v33 }
 0x288   :  { %v271_v45 = vmul.f32 %v1624_v38, %v2082_v20  ;;  %v264_v46 = vadd.f32 1e-05, %v260_v37  ;;  %v620_v20 = vrot.slane %v617_v52, 2  ;;  %v513_v37 = vrot.slane %v509_v15, 3 }
 0x289   :  { %1631 = vrsqrt.f32 %v419_v44 }
 0x28a   :  { %v281_v60 = vmul.f32 %v2225_v39, %v271_v45  ;;  %1633 = vrsqrt.f32 %v264_v46 }
 0x28b   :  { %1635 = vrsqrt.f32 %v422_v58 }
 0x28c   :  { %v1626_v49 = vpop.eup %1625  ;;  %v291_v7 = vadd.f32 %v2229_v55, %v281_v60  ;;  %1637 = vrcp.f32 %v617_v52  ;;  %v564_v52 = vpop.permute.xlu0 %563 }
 0x28d   :  { %v1628_v8 = vpop.eup %1627  ;;  %v273_v16 = vmul.f32 %v1626_v49, %v2090_v28  ;;  %1639 = vrcp.f32 %v619_v12 }
 0x28e   :  { %v478_v6 = vmul.f32 %v2214_v1, %v291_v7  ;;  %v587_v62 = vmul.f32 %v2149_v9, %v291_v7  ;;  %v428_v25 = vmul.f32 %v1628_v8, %v2088_v27  ;;  %1641 = vrcp.f32 %v620_v20 }
 0x28f   :  { %v1630_v14 = vpop.eup %1629  ;;  %v283_v19 = vmul.f32 %v2225_v39, %v273_v16  ;;  %1643 = vrcp.f32 %v621_v17 }
 0x290   :  { %v487_v23 = vrot.slane %v478_v6, 4  ;;  %v596_v24 = vrot.slane %v587_v62, 4  ;;  %v270_v29 = vmul.f32 %v1630_v14, %v2094_v30  ;;  %1645 = vrcp.f32 %v509_v15 }
 0x291   :  { %v293_v28 = vadd.f32 %v2229_v55, %v283_v19  ;;  %v432_v27 = vmul.f32 %v2225_v39, %v428_v25  ;;  %1647 = vrcp.f32 %v511_v63 }
 0x292   :  { %v488_v33 = vadd.f32 %v487_v23, %v478_v6  ;;  %v597_v34 = vadd.f32 %v596_v24, %v587_v62  ;;  %v280_v44 = vmul.f32 %v2225_v39, %v270_v29  ;;  %1649 = vrcp.f32 %v512_v32 }
 0x293   :  { %v1632_v9 = vpop.eup %1631  ;;  %v589_v38 = vmul.f32 %v2212_v0, %v293_v28  ;;  %v480_v30 = vmul.f32 %v2198_v50, %v293_v28  ;;  %1651 = vrcp.f32 %v513_v37 }
 0x294   :  { %v1634_v45 = vpop.eup %1633  ;;  %v427_v46 = vmul.f32 %v1632_v9, %v2114_v42  ;;  %v290_v60 = vadd.f32 %v2229_v55, %v280_v44  ;;  %v598_v7 = vrot.slane %v597_v34, 2  ;;  %v489_v8 = vrot.slane %v488_v33, 2 }
 0x295   :  { %v272_v58 = vmul.f32 %v1634_v45, %v2108_v40  ;;  %v608_v49 = vrot.slane %v589_v38, 4  ;;  %v1636_v12 = vpop.eup %1635  ;;  %v2251_v42 = vadd.f32 %v2229_v55, %v432_v27  ;;  %v499_v62 = vrot.slane %v480_v30, 4 }
 0x296   :  { %v431_v0 = vmul.f32 %v2225_v39, %v427_v46  ;;  %v477_v16 = vmul.f32 %v2218_v5, %v290_v60  ;;  %v586_v20 = vmul.f32 %v564_v52, %v290_v60  ;;  %v2256_v14 = vpop.eup %1637  ;;  %v599_v29 = vadd.f32 %v598_v7, %v597_v34 }
 0x297   :  { %v282_v15 = vmul.f32 %v2225_v39, %v272_v58  ;;  %v609_v6 = vadd.f32 %v608_v49, %v589_v38  ;;  %v490_v63 = vadd.f32 %v489_v8, %v488_v33  ;;  %v430_v28 = vmul.f32 %v1636_v12, %v2102_v36  ;;  %v1640_v32 = vpop.eup %1639 }
 0x298   :  { %v2254_v40 = vadd.f32 %v2229_v55, %v431_v0  ;;  %v481_v19 = vrot.slane %v477_v16, 4  ;;  %v590_v23 = vrot.slane %v586_v20, 4  ;;  %v1642_v45 = vpop.eup %1641  ;;  %v527_v27 = vmul.f32 %v2214_v1, %v2251_v42 }
 0x299   :  { %v292_v17 = vadd.f32 %v2229_v55, %v282_v15  ;;  %v610_v24 = vrot.slane %v609_v6, 2  ;;  %v500_v58 = vadd.f32 %v499_v62, %v480_v30  ;;  %v1644_v60 = vpop.eup %1643  ;;  %v600_v7 = vrot.slane %v599_v29, 1 }
 0x29a   :  { %v526_v25 = vmul.f32 %v2218_v5, %v2254_v40  ;;  %v482_v38 = vadd.f32 %v481_v19, %v477_v16  ;;  %v591_v44 = vadd.f32 %v590_v23, %v586_v20  ;;  %v1646_v36 = vpop.eup %1645  ;;  %v491_v1 = vrot.slane %v490_v63, 1 }
 0x29b   :  { %v479_v9 = vmul.f32 %v2164_v22, %v292_v17  ;;  %v588_v37 = vmul.f32 %v2179_v41, %v292_v17  ;;  %v611_v52 = vadd.f32 %v610_v24, %v609_v6  ;;  %v434_v41 = vmul.f32 %v2225_v39, %v430_v28  ;;  %v2267_v12 = vpop.eup %1647 }
 0x29c   :  { %v530_v46 = vrot.slane %v526_v25, 4  ;;  %v483_v33 = vrot.slane %v482_v38, 2  ;;  %v592_v49 = vrot.slane %v591_v44, 2  ;;  %v2269_v17 = vpop.eup %1649  ;;  %v536_v30 = vrot.slane %v527_v27, 4 }
 0x29d   :  { %v493_v5 = vrot.slane %v479_v9, 4  ;;  %v602_v34 = vrot.slane %v588_v37, 4  ;;  %v612_v8 = vrot.slane %v611_v52, 1  ;;  %v501_v57 = vrot.slane %v500_v58, 2 }
 0x29e   :  { %v531_v0 = vadd.f32 %v530_v46, %v526_v25  ;;  %v484_v15 = vadd.f32 %v483_v33, %v482_v38  ;;  %v593_v16 = vadd.f32 %v592_v49, %v591_v44  ;;  %v2271_v25 = vpop.eup %1651  ;;  %v601_v53 = vadd.f32 %v600_v7, %v599_v29 }
 0x29f   :  { %v603_v20 = vadd.f32 %v602_v34, %v588_v37  ;;  %v494_v62 = vadd.f32 %v493_v5, %v479_v9  ;;  %v613_v28 = vadd.f32 %v612_v8, %v611_v52  ;;  %v492_v38 = vadd.f32 %v491_v1, %v490_v63 }
 0x2a0   :  { %v532_v6 = vrot.slane %v531_v0, 2  ;;  %v485_v19 = vrot.slane %v484_v15, 1  ;;  %v594_v23 = vrot.slane %v593_v16, 1  ;;  %v502_v44 = vadd.f32 %v501_v57, %v500_v58 }
 0x2a1   :  { %v604_v24 = vrot.slane %v603_v20, 2  ;;  %v495_v11 = vrot.slane %v494_v62, 2  ;;  %v2274_v37 = vadd.f32 %v2229_v55, %v434_v41  ;;  %v629_v48 = vmul.f32 %v1640_v32, %v601_v53 }
 0x2a2   :  { %v533_v46 = vadd.f32 %v532_v6, %v531_v0  ;;  %v486_v33 = vadd.f32 %v485_v19, %v484_v15  ;;  %v595_v49 = vadd.f32 %v594_v23, %v593_v16  ;;  %v503_v39 = vrot.slane %v502_v44, 1 }
 0x2a3   :  { %v605_v22 = vadd.f32 %v604_v24, %v603_v20  ;;  %v496_v9 = vadd.f32 %v495_v11, %v494_v62  ;;  %v633_v47 = vmul.f32 %v1644_v60, %v613_v28  ;;  %v521_v7 = vmul.f32 %v2267_v12, %v492_v38 }
 0x2a4   :  { %v534_v34 = vrot.slane %v533_v46, 1  ;;  %v504_v52 = vadd.f32 %v503_v39, %v502_v44  ;;  %v529_v57 = vmul.f32 %v2198_v50, %v2274_v37  ;;  %v519_v63 = vmul.f32 %v1646_v36, %v486_v33 }
 0x2a5   :  { %v606_v5 = vrot.slane %v605_v22, 1  ;;  %v497_v0 = vrot.slane %v496_v9, 1  ;;  %v627_v58 = vmul.f32 %v2256_v14, %v595_v49  ;;  %v537_v41 = vadd.f32 %v536_v30, %v527_v27 }
 0x2a6   :  { %v535_v56 = vadd.f32 %v534_v34, %v533_v46  ;;  %v525_v15 = vmul.f32 %v2271_v25, %v504_v52  ;;  %v548_v16 = vrot.slane %v529_v57, 4  ;;  %v714_v53 = vrot.slane %v629_v48, 7  ;;  %v640_v46 = vpop.permute.xlu1 %639 }
 0x2a7   :  { %v607_v29 = vadd.f32 %v606_v5, %v605_v22  ;;  %v498_v8 = vadd.f32 %v497_v0, %v496_v9  ;;  %v538_v39 = vrot.slane %v537_v41, 2  ;;  %v844_v60 = vrot.slane %v521_v7, 7 }
 0x2a8   :  { %v554_v20 = vmul.f32 %v1646_v36, %v535_v56  ;;  %v549_v1 = vadd.f32 %v548_v16, %v529_v57  ;;  %v716_v50 = vsel %vm715_vm4, %v714_v53, %v627_v58  ;;  %v720_v6 = vrot.slane %v633_v47, 5  ;;  %v2410_v16 = vld [vmem:[#allocation21_spill] sm:$0xff] }
 0x2a9   :  { %v631_v11 = vmul.f32 %v1642_v45, %v607_v29  ;;  %v523_v22 = vmul.f32 %v2269_v17, %v498_v8  ;;  %v539_v62 = vadd.f32 %v538_v39, %v537_v41  ;;  %v845_v27 = vsel %vm715_vm4, %v844_v60, %v519_v63  ;;  %v2412_v60 = vld [vmem:[#allocation24_spill] sm:$0xff] }
 0x2aa   :  { %v848_v30 = vrot.slane %v525_v15, 5  ;;  %v550_v56 = vrot.slane %v549_v1, 2  ;;  %v663_v23 = vmul.f32 %v2216_v3, %v2251_v42  ;;  %v662_v38 = vmul.f32 %v640_v46, %v2254_v40 }
 0x2ab   :  { %v717_v32 = vrot.slane %v631_v11, 6  ;;  %v846_v14 = vrot.slane %v523_v22, 6  ;;  %v540_v19 = vrot.slane %v539_v62, 1  ;;  %v2407_v34 = vmov 0.0|0.0   ;;  %v2409_v11 = vld [vmem:[#allocation20_spill] sm:$0xff]  ;;  %v2411_v22 = vld [vmem:[#allocation22_spill] sm:$0xff] }
 0x2ac   :  { %v551_v24 = vadd.f32 %v550_v56, %v549_v1  ;;  %v2408_v3 = vmov 0.0   ;;  %v672_v33 = vrot.slane %v663_v23, 4  ;;  %v666_v49 = vrot.slane %v662_v38, 4 }
 0x2ad   :  { %v719_v45 = vsel %vm718_vm5, %v717_v32, %v716_v50  ;;  %v847_v36 = vsel %vm718_vm5, %v846_v14, %v845_v27  ;;  %v541_v28 = vadd.f32 %v540_v19, %v539_v62  ;;  %v2413_v62 = vld [vmem:[#allocation19_spill] sm:$0xff] }
 0x2ae   :  { %v722_v48 = vsel %vm721_vm6, %v720_v6, %v719_v45  ;;  %v849_v47 = vsel %vm721_vm6, %v848_v30, %v847_v36  ;;  %v552_v44 = vrot.slane %v551_v24, 1  ;;  %v673_v9 = vadd.f32 %v672_v33, %v663_v23 }
 0x2af   :  { %1344 = vmatmul.mubr.f32.vlgmr.msra.gmra.mrb[4].mxu0 %v722_v48  ;;  %724 = vst [vmem:[#allocation11] sm:$0xf] %v722_v48  ;;  %1379 = vmatmul.mubr.f32.vlgmr.msra.gmra.mrb[4].mxu1 %v849_v47  ;;  %v555_v42 = vmul.f32 %v2267_v12, %v541_v28  ;;  %v667_v5 = vadd.f32 %v666_v49, %v662_v38 }
 0x2b0   :  { %1565 = vmatpush3.bf16.msra.mxu0 %v2122_v51  ;;  %1589 = vmatpush3.bf16.msra.mxu1 %v2126_v54  ;;  %v553_v51 = vadd.f32 %v552_v44, %v551_v24 }
 0x2b1   :  { %1566 = vmatprep.subr.bf16.mxu0 %v2407_v34  ;;  %1590 = vmatprep.subr.bf16.mxu1 %v2407_v34  ;;  %v1003_v40 = vrot.slane %v555_v42, 7  ;;  %v668_v29 = vrot.slane %v667_v5, 2 }
 0x2b2   :  { %1413 = vmatprep.mubr.msk.f32.mxu0 %vm1836_vm3, %v2408_v3  ;;  %1448 = vmatprep.mubr.msk.f32.mxu1 %vm1836_vm3, %v2408_v3  ;;  %v2304_v54 = vmul.f32 %v2271_v25, %v553_v51 }
 0x2b3   :  { %v2308_v12 = vsel %vm715_vm4, %v1003_v40, %v554_v20 }
 0x2b4   :  { %1568 = vmatpush3.bf16.msra.mxu0 %v2132_v59  ;;  %1592 = vmatpush3.bf16.msra.mxu1 %v2134_v61  ;;  %v674_v61 = vrot.slane %v673_v9, 2 }
 0x2b5   :  { %1569 = vmatprep.subr.bf16.mxu0 %v2407_v34  ;;  %1593 = vmatprep.subr.bf16.mxu1 %v2407_v34 }
 0x2b8   :  { %1571 = vmatpush3.bf16.msra.mxu0 %v2142_v2  ;;  %1595 = vmatpush3.bf16.msra.mxu1 %v2144_v4  ;;  %v675_v2 = vadd.f32 %v674_v61, %v673_v9  ;;  %v669_v4 = vadd.f32 %v668_v29, %v667_v5 }
 0x2b9   :  { %v692_v0 = vpop.xlane.xlu0 %691  ;;  %1572 = vmatprep.subr.bf16.mxu0 %v2407_v34  ;;  %1596 = vmatprep.subr.bf16.mxu1 %v2407_v34 }
 0x2ba   :  { %v693_v59 = vmax.f32 %v692_v0, 1.0  ;;  %v670_v52 = vrot.slane %v669_v4, 1 }
 0x2bc   :  { %v695_v25 = vrot.slane %v693_v59, 1  ;;  %1574 = vmatpush3.bf16.msra.mxu0 %v2152_v10  ;;  %1653 = vrcp.f32 %v693_v59  ;;  %1598 = vmatpush3.bf16.msra.mxu1 %v2154_v13  ;;  %v676_v10 = vrot.slane %v675_v2, 1  ;;  %v697_v32 = vrot.slane %v693_v59, 3 }
 0x2bd   :  { %1575 = vmatprep.subr.bf16.mxu0 %v2407_v34  ;;  %1599 = vmatprep.subr.bf16.mxu1 %v2407_v34  ;;  %v696_v50 = vrot.slane %v693_v59, 2  ;;  %v1007_v59 = vrot.slane %v2304_v54, 5 }
 0x2be   :  { %1655 = vrcp.f32 %v695_v25  ;;  %v677_v57 = vadd.f32 %v676_v10, %v675_v2 }
 0x2c0   :  { %1577 = vmatpush3.bf16.msra.mxu0 %v2160_v18  ;;  %1601 = vmatpush3.bf16.msra.mxu1 %v2162_v21  ;;  %v671_v21 = vadd.f32 %v670_v52, %v669_v4 }
 0x2c1   :  { %1578 = vmatprep.subr.bf16.mxu0 %v2407_v34  ;;  %1602 = vmatprep.subr.bf16.mxu1 %v2407_v34 }
 0x2c4   :  { %1580 = vmatpush3.bf16.msra.mxu0 %v2170_v26  ;;  %1604 = vmatpush3.bf16.msra.mxu1 %v2172_v31 }
 0x2c5   :  { %1581 = vmatprep.subr.bf16.mxu0 %v2407_v34  ;;  %1605 = vmatprep.subr.bf16.mxu1 %v2407_v34 }
 0x2c6   :  { %v412_v13 = vpop.xlane.xlu1 %411  ;;  %v1654_v7 = vpop.eup %1653 }
 0x2c7   :  { %v417_v18 = vmul.f32 0.0078125, %v412_v13  ;;  %v703_v31 = vmul.f32 %v1654_v7, %v671_v21 }
 0x2c8   :  { %v1656_v63 = vpop.eup %1655  ;;  %1583 = vmatpush3.bf16.msra.mxu0 %v2177_v35  ;;  %1607 = vmatpush3.bf16.msra.mxu1 %v2182_v43 }
 0x2c9   :  { %v421_v58 = vadd.f32 1e-05, %v417_v18  ;;  %1584 = vmatprep.subr.bf16.mxu0 %v2407_v34  ;;  %v705_v26 = vmul.f32 %v1656_v63, %v677_v57  ;;  %1608 = vmatprep.subr.bf16.mxu1 %v2407_v34 }
 0x2ca   :  { %v661_v8 = vpop.permute.xlu1 %660 }
 0x2cb   :  { %1657 = vrsqrt.f32 %v421_v58  ;;  %v729_v41 = vrot.slane %v705_v26, 7  ;;  %v665_v15 = vmul.f32 %v661_v8, %v2274_v37  ;;  %v2414_v37 = vld [vmem:[#allocation23_spill] sm:$0xff] }
 0x2cc   :  { %1586 = vmatpush3.bf16.msra.mxu0 %v2409_v11  ;;  %1610 = vmatpush3.bf16.msra.mxu1 %v2410_v16  ;;  %1659 = vrcp.f32 %v697_v32 }
 0x2cd   :  { %v730_v35 = vsel %vm715_vm4, %v729_v41, %v703_v31  ;;  %v684_v20 = vrot.slane %v665_v15, 4  ;;  %1661 = vrcp.f32 %v696_v50 }
 0x2cf   :  { %v685_v43 = vadd.f32 %v684_v20, %v665_v15 }
 0x2d1   :  { %v686_v6 = vrot.slane %v685_v43, 2 }
 0x2d3   :  { %v687_v30 = vadd.f32 %v686_v6, %v685_v43 }
 0x2d5   :  { %v1658_v53 = vpop.eup %1657  ;;  %v688_v23 = vrot.slane %v687_v30, 1 }
 0x2d6   :  { %v429_v39 = vmul.f32 %v1658_v53, %v2411_v22  ;;  %v1660_v44 = vpop.eup %1659 }
 0x2d7   :  { %v689_v38 = vadd.f32 %v688_v23, %v687_v30  ;;  %v1662_v3 = vpop.eup %1661 }
 0x2d8   :  { %v433_v1 = vmul.f32 %v2412_v60, %v429_v39 }
 0x2d9   :  { %v709_v51 = vmul.f32 %v1660_v44, %v689_v38 }
 0x2da   :  { %v437_v14 = vadd.f32 %v2229_v55, %v433_v1 }
 0x2db   :  { %v733_v0 = vrot.slane %v709_v51, 5 }
 0x2dc   :  { %v528_v45 = vmul.f32 %v2413_v62, %v437_v14  ;;  %v664_v27 = vmul.f32 %v2414_v37, %v437_v14 }
 0x2de   :  { %v678_v56 = vrot.slane %v664_v27, 4  ;;  %v542_v48 = vrot.slane %v528_v45, 4 }
 0x2e0   :  { %v679_v36 = vadd.f32 %v678_v56, %v664_v27  ;;  %v543_v19 = vadd.f32 %v542_v48, %v528_v45 }
 0x2e2   :  { %v680_v47 = vrot.slane %v679_v36, 2  ;;  %v544_v24 = vrot.slane %v543_v19, 2 }
 0x2e4   :  { %v681_v46 = vadd.f32 %v680_v47, %v679_v36  ;;  %v545_v28 = vadd.f32 %v544_v24, %v543_v19 }
 0x2e6   :  { %v682_v34 = vrot.slane %v681_v46, 1  ;;  %v546_v55 = vrot.slane %v545_v28, 1 }
 0x2e8   :  { %v683_v42 = vadd.f32 %v682_v34, %v681_v46  ;;  %v547_v33 = vadd.f32 %v546_v55, %v545_v28 }
 0x2ea   :  { %v707_v40 = vmul.f32 %v1662_v3, %v683_v42  ;;  %v556_v49 = vmul.f32 %v2269_v17, %v547_v33 }
 0x2ec   :  { %v731_v9 = vrot.slane %v707_v40, 6  ;;  %v1005_v5 = vrot.slane %v556_v49, 6 }
 0x2ee   :  { %v732_v61 = vsel %vm718_vm5, %v731_v9, %v730_v35  ;;  %v1006_v25 = vsel %vm718_vm5, %v1005_v5, %v2308_v12 }
 0x2ef   :  { %v734_v29 = vsel %vm721_vm6, %v733_v0, %v732_v61  ;;  %v1008_v2 = vsel %vm721_vm6, %v1007_v59, %v1006_v25 }
 0x2f0   :  { %1414 = vmatmul.mubr.f32.vlgmr.msra.gmra.mrb[6].mxu0 %v734_v29  ;;  %736 = vst [vmem:[#allocation12] sm:$0xf] %v734_v29  ;;  %1449 = vmatmul.mubr.f32.vlgmr.msra.gmra.mrb[6].mxu1 %v1008_v2 }
 0x2f1   :  { %1784 = shalt.err (!%p1781_p2)
}
 0x2f2   :  { %s1785_s5 = scalar_lea.hbm %s2390_s14, 64 }
 0x2f3   :  { %p1786_p3 = scmp.ne.s32.totalorder %s2390_s14, %s1785_s5  ;;  %p1789_p4 = scmp.lt.u32.totalorder %s1785_s5, %s2390_s14 }
 0x2f5   :  { %p1791_p5 = pnand %p1789_p4, %p1786_p3 }
 0x2f7   :  { %1794 = shalt.err (!%p1791_p5)
}
 0x2f8   :  { %1095 = dma.vmem_to_hbm [thread:$0]  %s1093_s11, 64, %s2390_s14, [#allocation4]  }
 0x2f9   :  { %s1795_s16 = scalar_lea.vmem %s1103_s8, 64  ;;  %p1800_p7 = scmp.lt.s32.totalorder %s1103_s8, %s1103_s8 }
 0x2fa   :  { %p1796_p6 = scmp.ne.s32.totalorder %s1103_s8, %s1795_s16  ;;  %p1801_p8 = scmp.lt.s32.totalorder %s1795_s16, %s1795_s16 }
 0x2fc   :  { %p1802_p9 = por %p1801_p8, %p1800_p7 }
 0x2fe   :  { %p1803_p10 = pnand %p1802_p9, %p1796_p6 }
 0x300   :  { %1806 = shalt.err (!%p1803_p10)
}
 0x301   :  { %s1807_s22 = scalar_lea.hbm %s2391_s15, 64 }
 0x302   :  { %p1808_p11 = scmp.ne.s32.totalorder %s2391_s15, %s1807_s22  ;;  %p1811_p12 = scmp.lt.u32.totalorder %s1807_s22, %s2391_s15 }
 0x304   :  { %p1813_p13 = pnand %p1811_p12, %p1808_p11 }
 0x306   :  { %1816 = shalt.err (!%p1813_p13)
}
 0x307   :  { %1105 = dma.vmem_to_hbm [thread:$0]  %s1103_s8, 64, %s2391_s15, [#allocation13]   ;;  %v1126_v54 = vld [vmem:[#allocation10] ss:$0 sm:$0xff] }
 0x382   :  { %v836_v17 = vpop.f32.mrb[4].mxu0  ;;  %v917_v12 = vpop.f32.mrb[4].mxu1 }
 0x383   :  { %v1345_v4 = vpop.f32.mrb[5].mxu0  ;;  %v918_v10 = vadd.f32 %v917_v12, %v836_v17  ;;  %v1380_v52 = vpop.f32.mrb[5].mxu1 }
 0x385   :  { %v927_v13 = vadd.f32 %v1126_v54, %v918_v10 }
 0x387   :  { %928 = vst [vmem:[%s2388_s12] sm:$0xf] %v927_v13 }
 0x3c3   :  { %v995_v7 = vpop.f32.mrb[6].mxu0  ;;  %v1076_v18 = vpop.f32.mrb[6].mxu1 }
 0x3c4   :  { %v1077_v57 = vadd.f32 %v1076_v18, %v995_v7  ;;  %v1415_v63 = vpop.f32.mrb[7].mxu0  ;;  %v1450_v21 = vpop.f32.mrb[7].mxu1 }
 0x3c6   :  { %v1080_v58 = vadd.f32 %v1126_v54, %v1077_v57 }
 0x3c8   :  { %1081 = vst [vmem:[%s2389_s13] sm:$0xf] %v1080_v58 }
 0x3c9   :  { %1823 = dma.done.wait [#allocation4], 64  }
 0x3ca   :  { %1824 = vsyncadd [#allocation4], 4294967232 }
 0x3cb   :  { %1825 = dma.done.wait [#allocation13], 64  }
 0x3cc   :  { %1826 = vsyncadd [#allocation13], 4294967232 }
 0x3cd   :  { %1116 = vsyncpa [#allocation3], 1 }
 0x3ce   :  { %1117 = vsyncpa [#allocation6], 1 }
 0x3cf   :  { %1118 = vsyncpa [#allocation9], 1 }
 0x3d0   :  { %1119 = vsyncpa [#allocation4], 1 }
 0x3d1   :  { %1120 = vsyncpa [#allocation13], 1 }

</bundles_post_ra>
